<compile_context>
chip_gen: v6e
topology: v6e:2x2x1
jax: 0.10.0
libtpu: 0.0.40
codegen_flags: <defaults>
</compile_context>

<pallas_src>
import math
import functools

import jax
import jax.numpy as jnp
from jax.experimental import pallas as pl
from jax.experimental.pallas import tpu as pltpu


def mab_kernel(q_ref, k_ref,
               wqT_ref, bq_ref, wkvT_ref, bkv_ref, woT_ref, bo_ref,
               out_ref, o_acc, *, num_heads):
    # q_ref:   (BB, Nq, dim_Q)   bf16
    # k_ref:   (BB, Nk, dim_K)   bf16
    # wqT_ref: (dim_Q, dim_V)    bf16   (pre-transposed)
    # wkvT_ref:(dim_K, 2*dim_V)  bf16   (pre-transposed, scale folded into K half)
    # woT_ref: (dim_V, dim_V)    bf16   (pre-transposed)
    # b*_ref:  (1, dim)          f32
    # out_ref: (BB, Nq, dim_V)   f32
    # o_acc:   (BB, Nq, dim_V)   f32 VMEM scratch (per-head output slab)
    BB, Nq, dim_Q = q_ref.shape
    _, Nk, dim_K = k_ref.shape
    dim_V = out_ref.shape[-1]
    ds = dim_V // num_heads

    # ---- Projections: one big matmul each (M = BB*N rows) ------------------
    q_flat = q_ref[...].reshape(BB * Nq, dim_Q)
    k_flat = k_ref[...].reshape(BB * Nk, dim_K)

    Qp = (jnp.dot(q_flat, wqT_ref[...], preferred_element_type=jnp.float32)
          + bq_ref[...])                                   # (BB*Nq, dim_V)  f32
    KVp = (jnp.dot(k_flat, wkvT_ref[...], preferred_element_type=jnp.float32)
           + bkv_ref[...])                                 # (BB*Nk, 2*dim_V) f32

    Qp = Qp.reshape(BB, Nq, dim_V)
    KVp = KVp.reshape(BB, Nk, 2 * dim_V)

    # ---- Per-head attention (scale already folded into K projection) -------
    for h in range(num_heads):                             # static unroll
        lo, hi = h * ds, (h + 1) * ds
        qh = Qp[:, :, lo:hi]                               # (BB, Nq, ds)
        kh = KVp[:, :, lo:hi]                              # (BB, Nk, ds)  pre-scaled
        vh = KVp[:, :, dim_V + lo:dim_V + hi]              # (BB, Nk, ds)

        s = jnp.einsum('bqd,bkd->bqk', qh, kh,
                       preferred_element_type=jnp.float32)  # (BB, Nq, Nk)
        m = jnp.max(s, axis=-1, keepdims=True)
        e = jnp.exp(s - m)
        inv = pl.reciprocal(jnp.sum(e, axis=-1, keepdims=True), approx=True)
        a = e * inv                                        # softmax, f32

        o_acc[:, :, lo:hi] = qh + jnp.einsum(
            'bqk,bkd->bqd', a, vh, preferred_element_type=jnp.float32)

    # ---- Output FFN: O = O + relu(O @ woT + bo) -----------------------------
    O = o_acc[...].reshape(BB * Nq, dim_V)                 # f32
    ff = (jnp.dot(O.astype(woT_ref.dtype), woT_ref[...],
                  preferred_element_type=jnp.float32) + bo_ref[...])
    out = O + jnp.maximum(ff, 0.0)
    out_ref[...] = out.reshape(BB, Nq, dim_V).astype(out_ref.dtype)


def _choose_batch_block(B, Nq, Nk, dim_Q, dim_K, dim_V,
                        in_bytes=2, target_rows=512, vmem_budget=16 << 20):
    """How many batch elements to fold into one grid step."""
    # rough per-batch-element VMEM cost (double-buffered I/O + f32 temporaries)
    per_b = 2 * in_bytes * (Nq * dim_Q + Nk * dim_K)       # Q/K blocks (x2 buffers)
    per_b += 2 * 4 * Nq * dim_V                            # output block (x2 buffers)
    per_b += 4 * Nq * (3 * dim_V + 2 * Nk)                 # scratch slab, Qp/KVp, scores
    cap = max(1, vmem_budget // max(per_b, 1))
    limit = max(1, min(cap, max(1, target_rows // max(Nq, 1)), B))
    divs = [d for d in range(1, B + 1) if B % d == 0]
    bb = max(d for d in divs if d <= limit)
    # keep >= 2 grid steps when possible so both v7x TensorCores get work
    if B // bb < 2 and B >= 2:
        cands = [d for d in divs if B // d >= 2 and d <= limit]
        if cands:
            bb = max(cands)
    return bb


def mab_forward(Q, K, params, num_heads, compute_dtype=jnp.bfloat16):
    """Pallas implementation of MAB.forward (ln=False)."""
    if Q.shape[0] == 0:                    # matches `if Q.size(0) == 0: return Q`
        return Q
    B, Nq, dim_Q = Q.shape
    _, Nk, dim_K = K.shape
    dim_V = params["wq"].shape[0]
    assert dim_V % num_heads == 0

    scale = 1.0 / math.sqrt(dim_V)
    f32 = jnp.float32

    # Host-side weight prep: transpose once, fuse K/V projection, fold softmax
    # scale into the K half (Kp is only used for scores).
    wqT = params["wq"].T.astype(compute_dtype)                         # (dim_Q, dim_V)
    wkvT = jnp.concatenate([params["wk"].T * scale, params["wv"].T],
                           axis=1).astype(compute_dtype)               # (dim_K, 2*dim_V)
    woT = params["wo"].T.astype(compute_dtype)                         # (dim_V, dim_V)
    bq = params["bq"].reshape(1, dim_V).astype(f32)
    bkv = jnp.concatenate([params["bk"] * scale,
                           params["bv"]]).reshape(1, 2 * dim_V).astype(f32)
    bo = params["bo"].reshape(1, dim_V).astype(f32)

    Qc = Q.astype(compute_dtype)
    Kc = K.astype(compute_dtype)

    BB = _choose_batch_block(B, Nq, Nk, dim_Q, dim_K, dim_V,
                             in_bytes=jnp.dtype(compute_dtype).itemsize)
    grid = (B // BB,)

    kernel = functools.partial(mab_kernel, num_heads=num_heads)
    full = lambda shape: pl.BlockSpec(shape, lambda b: tuple(0 for _ in shape))

    return pl.pallas_call(
        kernel,
        out_shape=jax.ShapeDtypeStruct((B, Nq, dim_V), f32),
        grid=grid,
        in_specs=[
            pl.BlockSpec((BB, Nq, dim_Q), lambda b: (b, 0, 0)),
            pl.BlockSpec((BB, Nk, dim_K), lambda b: (b, 0, 0)),
            full(wqT.shape), full(bq.shape),
            full(wkvT.shape), full(bkv.shape),
            full(woT.shape), full(bo.shape),
        ],
        out_specs=pl.BlockSpec((BB, Nq, dim_V), lambda b: (b, 0, 0)),
        scratch_shapes=[pltpu.VMEM((BB, Nq, dim_V), f32)],
        compiler_params=pltpu.CompilerParams(
            dimension_semantics=("parallel",),
            vmem_limit_bytes=32 * 1024 * 1024,
        ),
    )(Qc, Kc, wqT, bq, wkvT, bkv, woT, bo)


# ----------------------------- references ------------------------------------

def mab_reference(Q, K, params, num_heads):
    """Pure-JAX f32 reference mirroring the PyTorch code exactly."""
    dim_V = params["wq"].shape[0]
    Qp = Q @ params["wq"].T + params["bq"]
    Kp = K @ params["wk"].T + params["bk"]
    Vp = K @ params["wv"].T + params["bv"]
    split = lambda X: jnp.concatenate(jnp.split(X, num_heads, axis=2), axis=0)
    Q_, K_, V_ = split(Qp), split(Kp), split(Vp)
    A = jax.nn.softmax(jnp.einsum("bqd,bkd->bqk", Q_, K_) / math.sqrt(dim_V), axis=2)
    O = Q_ + jnp.einsum("bqk,bkd->bqd", A, V_)
    O = jnp.concatenate(jnp.split(O, num_heads, axis=0), axis=2)
    O = O + jax.nn.relu(O @ params["wo"].T + params["bo"])
    return O


def mab_reference_matched(Q, K, params, num_heads, compute_dtype=jnp.bfloat16):
    """Reference applying the kernel's dtype strategy (bf16 operands, f32 accum)."""
    f32 = jnp.float32
    c = lambda x: x.astype(compute_dtype).astype(f32)
    dim_V = params["wq"].shape[0]
    scale = 1.0 / math.sqrt(dim_V)
    ds = dim_V // num_heads
    Qp = c(Q) @ c(params["wq"].T) + params["bq"]
    Kp = c(K) @ c(params["wk"].T * scale) + params["bk"] * scale
    Vp = c(K) @ c(params["wv"].T) + params["bv"]
    heads = []
    for h in range(num_heads):
        sl = slice(h * ds, (h + 1) * ds)
        qh, kh, vh = Qp[..., sl], Kp[..., sl], Vp[..., sl]
        a = jax.nn.softmax(jnp.einsum("bqd,bkd->bqk", qh, kh), axis=-1)
        heads.append(qh + jnp.einsum("bqk,bkd->bqd", a, vh))
    O = jnp.concatenate(heads, axis=-1)
    ff = c(O) @ c(params["wo"].T) + params["bo"]
    return O + jax.nn.relu(ff)


if __name__ == "__main__":
    # Small shapes consistent with the module's forward.
    B, Nq, Nk = 8, 8, 12
    dim_Q, dim_K, dim_V, num_heads = 16, 24, 32, 4

    key = jax.random.PRNGKey(0)
    ks = jax.random.split(key, 10)

    def linear_init(kw, kb, out_dim, in_dim):
        bound = 1.0 / math.sqrt(in_dim)
        w = jax.random.uniform(kw, (out_dim, in_dim), jnp.float32, -bound, bound)
        b = jax.random.uniform(kb, (out_dim,), jnp.float32, -bound, bound)
        return w, b

    wq, bq = linear_init(ks[0], ks[1], dim_V, dim_Q)
    wk, bk = linear_init(ks[2], ks[3], dim_V, dim_K)
    wv, bv = linear_init(ks[4], ks[5], dim_V, dim_K)
    wo, bo = linear_init(ks[6], ks[7], dim_V, dim_V)
    params = dict(wq=wq, bq=bq, wk=wk, bk=bk, wv=wv, bv=bv, wo=wo, bo=bo)

    Q = jax.random.normal(ks[8], (B, Nq, dim_Q), jnp.float32)
    K = jax.random.normal(ks[9], (B, Nk, dim_K), jnp.float32)

    out = mab_forward(Q, K, params, num_heads)
    out = jax.block_until_ready(out)
    assert out.shape == (B, Nq, dim_V)

    # Tight check vs a reference that uses the same bf16 operand strategy.
    ref_matched = mab_reference_matched(Q, K, params, num_heads)
    assert jnp.allclose(out, ref_matched, atol=1e-2, rtol=1e-2)

    # Sanity check vs the exact f32 PyTorch-equivalent math (bf16-level tolerance).
    ref_f32 = mab_reference(Q, K, params, num_heads)
    assert jnp.allclose(out, ref_f32, atol=1e-1, rtol=1e-1)

    print("KERNEL_OK")
</pallas_src>

<mosaic_0001>
module attributes {stable_mosaic.version = 11 : i64} {
  func.func @mab_kernel(%arg0: i32, %arg1: memref<4x8x16xbf16, #tpu.memory_space<vmem>>, %arg2: memref<4x12x24xbf16, #tpu.memory_space<vmem>>, %arg3: memref<16x32xbf16, #tpu.memory_space<vmem>>, %arg4: memref<1x32xf32, #tpu.memory_space<vmem>>, %arg5: memref<24x64xbf16, #tpu.memory_space<vmem>>, %arg6: memref<1x64xf32, #tpu.memory_space<vmem>>, %arg7: memref<32x32xbf16, #tpu.memory_space<vmem>>, %arg8: memref<1x32xf32, #tpu.memory_space<vmem>>, %arg9: memref<4x8x32xf32, #tpu.memory_space<vmem>>, %arg10: memref<4x8x32xf32, #tpu.memory_space<vmem>>) attributes {dimension_semantics = [#tpu.dimension_semantics<parallel>], iteration_bounds = array<i64: 2>, scalar_prefetch = 0 : i64, scratch_operands = 1 : i64, tpu.core_type = #tpu.core_type<tc>, window_params = [{transform_indices = @transform_0, window_bounds = array<i64: 4, 8, 16>}, {transform_indices = @transform_1, window_bounds = array<i64: 4, 12, 24>}, {pipeline_mode = #tpu.pipeline_mode<synchronous>, transform_indices = @transform_2, window_bounds = array<i64: 16, 32>}, {pipeline_mode = #tpu.pipeline_mode<synchronous>, transform_indices = @transform_3, window_bounds = array<i64: 1, 32>}, {pipeline_mode = #tpu.pipeline_mode<synchronous>, transform_indices = @transform_4, window_bounds = array<i64: 24, 64>}, {pipeline_mode = #tpu.pipeline_mode<synchronous>, transform_indices = @transform_5, window_bounds = array<i64: 1, 64>}, {pipeline_mode = #tpu.pipeline_mode<synchronous>, transform_indices = @transform_6, window_bounds = array<i64: 32, 32>}, {pipeline_mode = #tpu.pipeline_mode<synchronous>, transform_indices = @transform_7, window_bounds = array<i64: 1, 32>}, {transform_indices = @transform_8, window_bounds = array<i64: 4, 8, 32>}]} {
    %c0 = arith.constant 0 : index
    %c0_0 = arith.constant 0 : index
    %c0_1 = arith.constant 0 : index
    %0 = vector.load %arg1[%c0, %c0_0, %c0_1] : memref<4x8x16xbf16, #tpu.memory_space<vmem>>, vector<4x8x16xbf16>
    %1 = vector.shape_cast %0 : vector<4x8x16xbf16> to vector<32x16xbf16>
    %c0_2 = arith.constant 0 : index
    %c0_3 = arith.constant 0 : index
    %c0_4 = arith.constant 0 : index
    %2 = vector.load %arg2[%c0_2, %c0_3, %c0_4] : memref<4x12x24xbf16, #tpu.memory_space<vmem>>, vector<4x12x24xbf16>
    %3 = vector.shape_cast %2 : vector<4x12x24xbf16> to vector<48x24xbf16>
    %c0_5 = arith.constant 0 : index
    %c0_6 = arith.constant 0 : index
    %4 = vector.load %arg3[%c0_5, %c0_6] : memref<16x32xbf16, #tpu.memory_space<vmem>>, vector<16x32xbf16>
    %cst = arith.constant dense<0.000000e+00> : vector<32x32xf32>
    %5 = tpu.matmul %1, %4, %cst {dimension_numbers = #tpu.dot_dimension_numbers<[1], [0], [0], [1], [0, 0, 1, 1], [], []>} : vector<32x16xbf16>, vector<16x32xbf16>, vector<32x32xf32> -> vector<32x32xf32>
    %c0_7 = arith.constant 0 : index
    %c0_8 = arith.constant 0 : index
    %6 = vector.load %arg4[%c0_7, %c0_8] : memref<1x32xf32, #tpu.memory_space<vmem>>, vector<1x32xf32>
    %7 = vector.broadcast %6 : vector<1x32xf32> to vector<32x32xf32>
    %8 = arith.addf %5, %7 : vector<32x32xf32>
    %c0_9 = arith.constant 0 : index
    %c0_10 = arith.constant 0 : index
    %9 = vector.load %arg5[%c0_9, %c0_10] : memref<24x64xbf16, #tpu.memory_space<vmem>>, vector<24x64xbf16>
    %cst_11 = arith.constant dense<0.000000e+00> : vector<48x64xf32>
    %10 = tpu.matmul %3, %9, %cst_11 {dimension_numbers = #tpu.dot_dimension_numbers<[1], [0], [0], [1], [0, 0, 1, 1], [], []>} : vector<48x24xbf16>, vector<24x64xbf16>, vector<48x64xf32> -> vector<48x64xf32>
    %c0_12 = arith.constant 0 : index
    %c0_13 = arith.constant 0 : index
    %11 = vector.load %arg6[%c0_12, %c0_13] : memref<1x64xf32, #tpu.memory_space<vmem>>, vector<1x64xf32>
    %12 = vector.broadcast %11 : vector<1x64xf32> to vector<48x64xf32>
    %13 = arith.addf %10, %12 : vector<48x64xf32>
    %14 = vector.shape_cast %8 : vector<32x32xf32> to vector<4x8x32xf32>
    %15 = vector.shape_cast %13 : vector<48x64xf32> to vector<4x12x64xf32>
    %16 = vector.extract_strided_slice %14 {offsets = [0, 0, 0], sizes = [4, 8, 8], strides = [1, 1, 1]} : vector<4x8x32xf32> to vector<4x8x8xf32>
    %17 = vector.extract_strided_slice %15 {offsets = [0, 0, 0], sizes = [4, 12, 8], strides = [1, 1, 1]} : vector<4x12x64xf32> to vector<4x12x8xf32>
    %18 = vector.extract_strided_slice %15 {offsets = [0, 0, 32], sizes = [4, 12, 8], strides = [1, 1, 1]} : vector<4x12x64xf32> to vector<4x12x8xf32>
    "tpu.trace_start"() <{level = 10 : i32, message = "bqd,bkd->bqk"}> : () -> ()
    %cst_14 = arith.constant dense<0.000000e+00> : vector<4x8x12xf32>
    %19 = tpu.matmul %16, %17, %cst_14 {dimension_numbers = #tpu.dot_dimension_numbers<[2], [2], [1], [1], [0, 0, 0, 1, 1, 1], [0], [0]>} : vector<4x8x8xf32>, vector<4x12x8xf32>, vector<4x8x12xf32> -> vector<4x8x12xf32>
    "tpu.trace_stop"() : () -> ()
    %cst_15 = arith.constant dense<0xFF800000> : vector<4x8xf32>
    %20 = vector.multi_reduction <maximumf>, %19, %cst_15 [2] : vector<4x8x12xf32> to vector<4x8xf32>
    %21 = vector.shape_cast %20 : vector<4x8xf32> to vector<4x8x1xf32>
    %22 = vector.broadcast %21 : vector<4x8x1xf32> to vector<4x8x12xf32>
    %23 = arith.subf %19, %22 : vector<4x8x12xf32>
    %24 = math.exp %23 : vector<4x8x12xf32>
    %cst_16 = arith.constant dense<0.000000e+00> : vector<4x8xf32>
    %25 = vector.multi_reduction <add>, %24, %cst_16 [2] : vector<4x8x12xf32> to vector<4x8xf32>
    %26 = vector.shape_cast %25 : vector<4x8xf32> to vector<4x8x1xf32>
    %27 = tpu.reciprocal %26 {approx = true} : vector<4x8x1xf32> -> vector<4x8x1xf32>
    %28 = vector.broadcast %27 : vector<4x8x1xf32> to vector<4x8x12xf32>
    %29 = arith.mulf %24, %28 : vector<4x8x12xf32>
    "tpu.trace_start"() <{level = 10 : i32, message = "bqk,bkd->bqd"}> : () -> ()
    %cst_17 = arith.constant dense<0.000000e+00> : vector<4x8x8xf32>
    %30 = tpu.matmul %29, %18, %cst_17 {dimension_numbers = #tpu.dot_dimension_numbers<[2], [1], [1], [2], [0, 0, 0, 1, 1, 2], [0], [0]>} : vector<4x8x12xf32>, vector<4x12x8xf32>, vector<4x8x8xf32> -> vector<4x8x8xf32>
    "tpu.trace_stop"() : () -> ()
    %31 = arith.addf %16, %30 : vector<4x8x8xf32>
    %c0_18 = arith.constant 0 : index
    %c0_19 = arith.constant 0 : index
    %c0_20 = arith.constant 0 : index
    %32 = vector.load %arg10[%c0_18, %c0_19, %c0_20] : memref<4x8x32xf32, #tpu.memory_space<vmem>>, vector<4x8x8xf32>
    tpu.vector_store %arg10[%c0_18, %c0_19, %c0_20], %31 {strides = array<i32>} : memref<4x8x32xf32, #tpu.memory_space<vmem>>, vector<4x8x8xf32>,
    %33 = vector.extract_strided_slice %14 {offsets = [0, 0, 8], sizes = [4, 8, 8], strides = [1, 1, 1]} : vector<4x8x32xf32> to vector<4x8x8xf32>
    %34 = vector.extract_strided_slice %15 {offsets = [0, 0, 8], sizes = [4, 12, 8], strides = [1, 1, 1]} : vector<4x12x64xf32> to vector<4x12x8xf32>
    %35 = vector.extract_strided_slice %15 {offsets = [0, 0, 40], sizes = [4, 12, 8], strides = [1, 1, 1]} : vector<4x12x64xf32> to vector<4x12x8xf32>
    "tpu.trace_start"() <{level = 10 : i32, message = "bqd,bkd->bqk"}> : () -> ()
    %cst_21 = arith.constant dense<0.000000e+00> : vector<4x8x12xf32>
    %36 = tpu.matmul %33, %34, %cst_21 {dimension_numbers = #tpu.dot_dimension_numbers<[2], [2], [1], [1], [0, 0, 0, 1, 1, 1], [0], [0]>} : vector<4x8x8xf32>, vector<4x12x8xf32>, vector<4x8x12xf32> -> vector<4x8x12xf32>
    "tpu.trace_stop"() : () -> ()
    %cst_22 = arith.constant dense<0xFF800000> : vector<4x8xf32>
    %37 = vector.multi_reduction <maximumf>, %36, %cst_22 [2] : vector<4x8x12xf32> to vector<4x8xf32>
    %38 = vector.shape_cast %37 : vector<4x8xf32> to vector<4x8x1xf32>
    %39 = vector.broadcast %38 : vector<4x8x1xf32> to vector<4x8x12xf32>
    %40 = arith.subf %36, %39 : vector<4x8x12xf32>
    %41 = math.exp %40 : vector<4x8x12xf32>
    %cst_23 = arith.constant dense<0.000000e+00> : vector<4x8xf32>
    %42 = vector.multi_reduction <add>, %41, %cst_23 [2] : vector<4x8x12xf32> to vector<4x8xf32>
    %43 = vector.shape_cast %42 : vector<4x8xf32> to vector<4x8x1xf32>
    %44 = tpu.reciprocal %43 {approx = true} : vector<4x8x1xf32> -> vector<4x8x1xf32>
    %45 = vector.broadcast %44 : vector<4x8x1xf32> to vector<4x8x12xf32>
    %46 = arith.mulf %41, %45 : vector<4x8x12xf32>
    "tpu.trace_start"() <{level = 10 : i32, message = "bqk,bkd->bqd"}> : () -> ()
    %cst_24 = arith.constant dense<0.000000e+00> : vector<4x8x8xf32>
    %47 = tpu.matmul %46, %35, %cst_24 {dimension_numbers = #tpu.dot_dimension_numbers<[2], [1], [1], [2], [0, 0, 0, 1, 1, 2], [0], [0]>} : vector<4x8x12xf32>, vector<4x12x8xf32>, vector<4x8x8xf32> -> vector<4x8x8xf32>
    "tpu.trace_stop"() : () -> ()
    %48 = arith.addf %33, %47 : vector<4x8x8xf32>
    %c0_25 = arith.constant 0 : index
    %c0_26 = arith.constant 0 : index
    %c8 = arith.constant 8 : index
    %49 = vector.load %arg10[%c0_25, %c0_26, %c8] : memref<4x8x32xf32, #tpu.memory_space<vmem>>, vector<4x8x8xf32>
    tpu.vector_store %arg10[%c0_25, %c0_26, %c8], %48 {strides = array<i32>} : memref<4x8x32xf32, #tpu.memory_space<vmem>>, vector<4x8x8xf32>,
    %50 = vector.extract_strided_slice %14 {offsets = [0, 0, 16], sizes = [4, 8, 8], strides = [1, 1, 1]} : vector<4x8x32xf32> to vector<4x8x8xf32>
    %51 = vector.extract_strided_slice %15 {offsets = [0, 0, 16], sizes = [4, 12, 8], strides = [1, 1, 1]} : vector<4x12x64xf32> to vector<4x12x8xf32>
    %52 = vector.extract_strided_slice %15 {offsets = [0, 0, 48], sizes = [4, 12, 8], strides = [1, 1, 1]} : vector<4x12x64xf32> to vector<4x12x8xf32>
    "tpu.trace_start"() <{level = 10 : i32, message = "bqd,bkd->bqk"}> : () -> ()
    %cst_27 = arith.constant dense<0.000000e+00> : vector<4x8x12xf32>
    %53 = tpu.matmul %50, %51, %cst_27 {dimension_numbers = #tpu.dot_dimension_numbers<[2], [2], [1], [1], [0, 0, 0, 1, 1, 1], [0], [0]>} : vector<4x8x8xf32>, vector<4x12x8xf32>, vector<4x8x12xf32> -> vector<4x8x12xf32>
    "tpu.trace_stop"() : () -> ()
    %cst_28 = arith.constant dense<0xFF800000> : vector<4x8xf32>
    %54 = vector.multi_reduction <maximumf>, %53, %cst_28 [2] : vector<4x8x12xf32> to vector<4x8xf32>
    %55 = vector.shape_cast %54 : vector<4x8xf32> to vector<4x8x1xf32>
    %56 = vector.broadcast %55 : vector<4x8x1xf32> to vector<4x8x12xf32>
    %57 = arith.subf %53, %56 : vector<4x8x12xf32>
    %58 = math.exp %57 : vector<4x8x12xf32>
    %cst_29 = arith.constant dense<0.000000e+00> : vector<4x8xf32>
    %59 = vector.multi_reduction <add>, %58, %cst_29 [2] : vector<4x8x12xf32> to vector<4x8xf32>
    %60 = vector.shape_cast %59 : vector<4x8xf32> to vector<4x8x1xf32>
    %61 = tpu.reciprocal %60 {approx = true} : vector<4x8x1xf32> -> vector<4x8x1xf32>
    %62 = vector.broadcast %61 : vector<4x8x1xf32> to vector<4x8x12xf32>
    %63 = arith.mulf %58, %62 : vector<4x8x12xf32>
    "tpu.trace_start"() <{level = 10 : i32, message = "bqk,bkd->bqd"}> : () -> ()
    %cst_30 = arith.constant dense<0.000000e+00> : vector<4x8x8xf32>
    %64 = tpu.matmul %63, %52, %cst_30 {dimension_numbers = #tpu.dot_dimension_numbers<[2], [1], [1], [2], [0, 0, 0, 1, 1, 2], [0], [0]>} : vector<4x8x12xf32>, vector<4x12x8xf32>, vector<4x8x8xf32> -> vector<4x8x8xf32>
    "tpu.trace_stop"() : () -> ()
    %65 = arith.addf %50, %64 : vector<4x8x8xf32>
    %c0_31 = arith.constant 0 : index
    %c0_32 = arith.constant 0 : index
    %c16 = arith.constant 16 : index
    %66 = vector.load %arg10[%c0_31, %c0_32, %c16] : memref<4x8x32xf32, #tpu.memory_space<vmem>>, vector<4x8x8xf32>
    tpu.vector_store %arg10[%c0_31, %c0_32, %c16], %65 {strides = array<i32>} : memref<4x8x32xf32, #tpu.memory_space<vmem>>, vector<4x8x8xf32>,
    %67 = vector.extract_strided_slice %14 {offsets = [0, 0, 24], sizes = [4, 8, 8], strides = [1, 1, 1]} : vector<4x8x32xf32> to vector<4x8x8xf32>
    %68 = vector.extract_strided_slice %15 {offsets = [0, 0, 24], sizes = [4, 12, 8], strides = [1, 1, 1]} : vector<4x12x64xf32> to vector<4x12x8xf32>
    %69 = vector.extract_strided_slice %15 {offsets = [0, 0, 56], sizes = [4, 12, 8], strides = [1, 1, 1]} : vector<4x12x64xf32> to vector<4x12x8xf32>
    "tpu.trace_start"() <{level = 10 : i32, message = "bqd,bkd->bqk"}> : () -> ()
    %cst_33 = arith.constant dense<0.000000e+00> : vector<4x8x12xf32>
    %70 = tpu.matmul %67, %68, %cst_33 {dimension_numbers = #tpu.dot_dimension_numbers<[2], [2], [1], [1], [0, 0, 0, 1, 1, 1], [0], [0]>} : vector<4x8x8xf32>, vector<4x12x8xf32>, vector<4x8x12xf32> -> vector<4x8x12xf32>
    "tpu.trace_stop"() : () -> ()
    %cst_34 = arith.constant dense<0xFF800000> : vector<4x8xf32>
    %71 = vector.multi_reduction <maximumf>, %70, %cst_34 [2] : vector<4x8x12xf32> to vector<4x8xf32>
    %72 = vector.shape_cast %71 : vector<4x8xf32> to vector<4x8x1xf32>
    %73 = vector.broadcast %72 : vector<4x8x1xf32> to vector<4x8x12xf32>
    %74 = arith.subf %70, %73 : vector<4x8x12xf32>
    %75 = math.exp %74 : vector<4x8x12xf32>
    %cst_35 = arith.constant dense<0.000000e+00> : vector<4x8xf32>
    %76 = vector.multi_reduction <add>, %75, %cst_35 [2] : vector<4x8x12xf32> to vector<4x8xf32>
    %77 = vector.shape_cast %76 : vector<4x8xf32> to vector<4x8x1xf32>
    %78 = tpu.reciprocal %77 {approx = true} : vector<4x8x1xf32> -> vector<4x8x1xf32>
    %79 = vector.broadcast %78 : vector<4x8x1xf32> to vector<4x8x12xf32>
    %80 = arith.mulf %75, %79 : vector<4x8x12xf32>
    "tpu.trace_start"() <{level = 10 : i32, message = "bqk,bkd->bqd"}> : () -> ()
    %cst_36 = arith.constant dense<0.000000e+00> : vector<4x8x8xf32>
    %81 = tpu.matmul %80, %69, %cst_36 {dimension_numbers = #tpu.dot_dimension_numbers<[2], [1], [1], [2], [0, 0, 0, 1, 1, 2], [0], [0]>} : vector<4x8x12xf32>, vector<4x12x8xf32>, vector<4x8x8xf32> -> vector<4x8x8xf32>
    "tpu.trace_stop"() : () -> ()
    %82 = arith.addf %67, %81 : vector<4x8x8xf32>
    %c0_37 = arith.constant 0 : index
    %c0_38 = arith.constant 0 : index
    %c24 = arith.constant 24 : index
    %83 = vector.load %arg10[%c0_37, %c0_38, %c24] : memref<4x8x32xf32, #tpu.memory_space<vmem>>, vector<4x8x8xf32>
    tpu.vector_store %arg10[%c0_37, %c0_38, %c24], %82 {strides = array<i32>} : memref<4x8x32xf32, #tpu.memory_space<vmem>>, vector<4x8x8xf32>,
    %c0_39 = arith.constant 0 : index
    %c0_40 = arith.constant 0 : index
    %c0_41 = arith.constant 0 : index
    %84 = vector.load %arg10[%c0_39, %c0_40, %c0_41] : memref<4x8x32xf32, #tpu.memory_space<vmem>>, vector<4x8x32xf32>
    %85 = vector.shape_cast %84 : vector<4x8x32xf32> to vector<32x32xf32>
    %86 = arith.truncf %85 : vector<32x32xf32> to vector<32x32xbf16>
    %c0_42 = arith.constant 0 : index
    %c0_43 = arith.constant 0 : index
    %87 = vector.load %arg7[%c0_42, %c0_43] : memref<32x32xbf16, #tpu.memory_space<vmem>>, vector<32x32xbf16>
    %cst_44 = arith.constant dense<0.000000e+00> : vector<32x32xf32>
    %88 = tpu.matmul %86, %87, %cst_44 {dimension_numbers = #tpu.dot_dimension_numbers<[1], [0], [0], [1], [0, 0, 1, 1], [], []>} : vector<32x32xbf16>, vector<32x32xbf16>, vector<32x32xf32> -> vector<32x32xf32>
    %c0_45 = arith.constant 0 : index
    %c0_46 = arith.constant 0 : index
    %89 = vector.load %arg8[%c0_45, %c0_46] : memref<1x32xf32, #tpu.memory_space<vmem>>, vector<1x32xf32>
    %90 = vector.broadcast %89 : vector<1x32xf32> to vector<32x32xf32>
    %91 = arith.addf %88, %90 : vector<32x32xf32>
    %cst_47 = arith.constant 0.000000e+00 : f32
    %92 = vector.broadcast %cst_47 : f32 to vector<32x32xf32>
    %93 = arith.maximumf %91, %92 : vector<32x32xf32>
    %94 = arith.addf %85, %93 : vector<32x32xf32>
    %95 = vector.shape_cast %94 : vector<32x32xf32> to vector<4x8x32xf32>
    %c0_48 = arith.constant 0 : index
    %c0_49 = arith.constant 0 : index
    %c0_50 = arith.constant 0 : index
    %96 = vector.load %arg9[%c0_48, %c0_49, %c0_50] : memref<4x8x32xf32, #tpu.memory_space<vmem>>, vector<4x8x32xf32>
    tpu.vector_store %arg9[%c0_48, %c0_49, %c0_50], %95 {strides = array<i32>} : memref<4x8x32xf32, #tpu.memory_space<vmem>>, vector<4x8x32xf32>,
    return
  }
  func.func @transform_0(%arg0: i32) -> (i32, i32, i32) {
    %c0_i32 = arith.constant 0 : i32
    %c0_i32_0 = arith.constant 0 : i32
    %c0_i32_1 = arith.constant 0 : i32
    return %arg0, %c0_i32, %c0_i32_0 : i32, i32, i32
  }
  func.func @transform_1(%arg0: i32) -> (i32, i32, i32) {
    %c0_i32 = arith.constant 0 : i32
    %c0_i32_0 = arith.constant 0 : i32
    %c0_i32_1 = arith.constant 0 : i32
    return %arg0, %c0_i32, %c0_i32_0 : i32, i32, i32
  }
  func.func @transform_2(%arg0: i32) -> (i32, i32) {
    %c0_i32 = arith.constant 0 : i32
    %c0_i32_0 = arith.constant 0 : i32
    %c0_i32_1 = arith.constant 0 : i32
    return %c0_i32, %c0_i32_0 : i32, i32
  }
  func.func @transform_3(%arg0: i32) -> (i32, i32) {
    %c0_i32 = arith.constant 0 : i32
    %c0_i32_0 = arith.constant 0 : i32
    %c0_i32_1 = arith.constant 0 : i32
    return %c0_i32, %c0_i32_0 : i32, i32
  }
  func.func @transform_4(%arg0: i32) -> (i32, i32) {
    %c0_i32 = arith.constant 0 : i32
    %c0_i32_0 = arith.constant 0 : i32
    %c0_i32_1 = arith.constant 0 : i32
    return %c0_i32, %c0_i32_0 : i32, i32
  }
  func.func @transform_5(%arg0: i32) -> (i32, i32) {
    %c0_i32 = arith.constant 0 : i32
    %c0_i32_0 = arith.constant 0 : i32
    %c0_i32_1 = arith.constant 0 : i32
    return %c0_i32, %c0_i32_0 : i32, i32
  }
  func.func @transform_6(%arg0: i32) -> (i32, i32) {
    %c0_i32 = arith.constant 0 : i32
    %c0_i32_0 = arith.constant 0 : i32
    %c0_i32_1 = arith.constant 0 : i32
    return %c0_i32, %c0_i32_0 : i32, i32
  }
  func.func @transform_7(%arg0: i32) -> (i32, i32) {
    %c0_i32 = arith.constant 0 : i32
    %c0_i32_0 = arith.constant 0 : i32
    %c0_i32_1 = arith.constant 0 : i32
    return %c0_i32, %c0_i32_0 : i32, i32
  }
  func.func @transform_8(%arg0: i32) -> (i32, i32, i32) {
    %c0_i32 = arith.constant 0 : i32
    %c0_i32_0 = arith.constant 0 : i32
    %c0_i32_1 = arith.constant 0 : i32
    return %arg0, %c0_i32, %c0_i32_0 : i32, i32, i32
  }
}

</mosaic_0001>

<bundles_post_ra>
// kernel: tpu_custom_call.1
= control target key start
LH: loop header
LB: loop body
LE: loop exit
PB: predicated region body
PF: predicated region fallthrough
CT: control target
= control target key end

     0   :  { %13 = vsyncpa [#allocation4], 0  ;;  %s5054_s0 = inlined_call_operand.vmem [shape: bf16[8,8,16], index: 0, kind: input, shape index: {}]   ;;  %s5055_s1 = inlined_call_operand.vmem [shape: bf16[8,12,24], index: 1, kind: input, shape index: {}]   ;;  %s5056_s2 = inlined_call_operand.vmem [shape: bf16[16,32], index: 2, kind: input, shape index: {}]   ;;  %s5057_s3 = inlined_call_operand.vmem [shape: f32[1,32], index: 3, kind: input, shape index: {}]   ;;  %s5058_s4 = inlined_call_operand.vmem [shape: bf16[24,64], index: 4, kind: input, shape index: {}]   ;;  %s5059_s5 = inlined_call_operand.vmem [shape: f32[1,64], index: 5, kind: input, shape index: {}]   ;;  %s5060_s6 = inlined_call_operand.vmem [shape: bf16[32,32], index: 6, kind: input, shape index: {}]   ;;  %s5061_s7 = inlined_call_operand.vmem [shape: f32[1,32], index: 7, kind: input, shape index: {}]   ;;  %s5062_s8 = inlined_call_operand.hbm [shape: f32[8,8,32], index: 8, kind: output, shape index: {}]  }
   0x1   :  { %15 = vsyncpa [#allocation4 + $0x1], 0  ;;  %s4399_s27 = smov 0   ;;  %s4401_s28 = smov 0  }
   0x2   :  { %s4403_s29 = smov 0   ;;  %s4405_s30 = smov 0  }
   0x3 LB: > { %s4420_s9 = sadd.s32 4294967295, %s4337_s30   ;;  %s3669_s10 = sadd.s32 4294967294, %s4337_s30   ;;  %s4337_s30 = sphi %s4405_s30, %s5068_s30   ;;  %s4333_s29 = sphi %s4403_s29, %s5067_s29   ;;  %s4329_s28 = sphi %s4401_s28, %s5066_s28   ;;  %s4325_s27 = sphi %s4399_s27, %s5065_s27  }
   0x4   : > { %s4424_s11 = sadd.s32 1, %s4337_s30   ;;  %s206_s12 = sadd.s32 1, %s4333_s29 }
   0x5   : > { %s203_s13 = ssub.s32 %s4337_s30, %s4424_s11  ;;  %p216_p0 = scmp.ne.s32.totalorder %s4333_s29, %s4329_s28 }
   0x6   : > { %p204_p1 = scmp.eq.s32.totalorder %s203_s13, 0  ;;  %p217_p2 = scmp.eq.s32.totalorder %s4420_s9, 1 }
   0x7   : > { %p222_p3 = scmp.ne.s32.totalorder %s4329_s28, %s4325_s27  ;;  %p223_p4 = scmp.eq.s32.totalorder %s3669_s10, 1 }
   0x8   : > { %s4435_s14 = scalar_select %p204_p1, %s4333_s29, %s206_s12  }
   0x9   : > { %p4437_p5 = por %p217_p2, %p216_p0  ;;  %p4441_p6 = por %p223_p4, %p222_p3 }
   0xa   : > { %p3672_p7 = scmp.ge.s32.totalorder %s4337_s30, 1  ;;  %p278_p8 = scmp.lt.s32.totalorder %s4337_s30, 3 }
   0xc   : > { %p279_p9 = pnand %p3672_p7, %p278_p8 }
   0xd   : > { %s3674_s23 = sshll.u32 (!%p279_p9), %s4420_s9, 2  ;;  %s4342_s21 = smov (!%p279_p9), 96  }
   0xe   : > { %282 = sbr.rel (%p279_p9) target bundleno = 2911 (0xb5f), region = 52  ;;  %p319_p10 = scmp.lt.s32.totalorder (!%p279_p9), %s3674_s23, 7 }
   0xf   : > { %s4345_s26 = smov (!%p279_p9), 112   ;;  %s4346_s10 = smov (!%p279_p9), 80  }
  0x10   : > { %s4348_s13 = smov (!%p279_p9), 72   ;;  %s4349_s17 = smov (!%p279_p9), 8  }
  0x11   : > { %s4351_s19 = smov (!%p279_p9), 24  }
  0x13   : > { %v4206_v0 = vld [vmem:[%s5058_s4 + $0x8] ss:$0 sps:$4 sm:$0xff]   ;;  %vm574_vm0 = vcmask 1043456   ;;  %v4339_v1 = vmov 0.0   ;;  %vm4340_vm1 = vmmov 0   ;;  %v4208_v3 = vld [vmem:[%s5056_s2] sm:$0xff]   ;;  %v509_v5 = vlaneseq }
  0x14   : > { %3905 = vmatprep.subr.bf16.mxu1 %v4339_v1  ;;  %v576_v2 = vsel %vm574_vm0, %v4206_v0, 0  ;;  %3909 = vmatprep.mubr.msk.bf16.mxu1 %vm4340_vm1, %v4339_v1  ;;  %v4207_v4 = vld [vmem:[%s5058_s4] sm:$0xff]   ;;  %v4341_v6 = vmov 1983009808   ;;  %s5070_s23 = smov (!%p319_p10, %s3674_s23), 7  ;;  %vm438_vm2 = vcmask 130048  }
  0x15   : > { %3906 = vmatpush3.bf16.msra.mxu1 %v576_v2  ;;  %3899 = vmatprep.subr.bf16.mxu0 %v4208_v3  ;;  %v507_v7 = vunpack.c.l.s4 %v4341_v6  ;;  %v510_v9 = vshrl.u32 %v509_v5, 7  ;;  %s3789_s24 = sshll.u32 %s5070_s23, 3  ;;  %s3675_s25 = sshll.u32 %s5070_s23, 2  ;;  %vm564_vm3 = vcmask 195584   ;;  %v3693_v40 = vld [vmem:[%s5059_s5] ss:$0 sm:$0xff] }
  0x16   : > { %3907 = vmatprep.subr.bf16.mxu1 %v4339_v1  ;;  %3900 = vmatpush3.bf16.msra.mxu0 %v4208_v3  ;;  %s4467_s12 = scalar_lea.vmem %s5055_s1, %s3789_s24  ;;  %s322_s18 = scalar_lea.vmem %s5054_s0, %s3675_s25  ;;  %vm648_vm4 = vcmask 64512   ;;  %v3687_v50 = vld [vmem:[%s5057_s3] ss:$0 sm:$0xff]  ;;  %vm960_vm5 = vcmask 97280   ;;  %vm2045_vm6 = vcmask 130112   ;;  %vm2762_vm7 = vcmask 195712  }
  0x17   : > { %3921 = vmatprep.subr.mxu0 %v4339_v1  ;;  %v508_v8 = vunpack.c.0.s8 %v507_v7  ;;  %v3679_v10 = vld.sshfl [vmem:[%s4467_s12] sm:$0x33 pattern:$0x76325410]  ;;  %v4210_v16 = vld [vmem:[%s322_s18 + $0x8] sm:$0xff]   ;;  %s4343_s24 = smov 120  }
  0x18   : > { %v3680_v11 = vld.sshfl [vmem:[%s4467_s12 + $0x4] sm:$0x3 pattern:$0x76325410]  ;;  %v360_v12 = vcombine.high %v3679_v10, %v3679_v10  ;;  %s4344_s25 = smov 88   ;;  %vm3479_vm8 = vcmask 261312  }
  0x19   : > { %3908 = vmatpush3.bf16.msra.mxu1 %v4207_v4  ;;  %v511_v13 = vsub.s32 %v508_v8, %v510_v9  ;;  %v3681_v14 = vld.sshfl [vmem:[%s4467_s12 + $0x8] sm:$0x33 pattern:$0x76325410]  ;;  %v4209_v15 = vld [vmem:[%s322_s18] sm:$0xff]   ;;  %s4350_s18 = smov 16  }
  0x1a   : > { %3942 = vmatprep.subr.mxu1 %v4339_v1  ;;  %v504_v17 = vcombine.low %v3679_v10, %v360_v12  ;;  %v505_v18 = vcombine.low %v3680_v11, %v3681_v14  ;;  %v375_v19 = vcombine.high %v3681_v14, %v3681_v14  ;;  %3901 = vmatprep.mubr.msk.bf16.mxu0 %vm438_vm2, %v4209_v15  ;;  %v3682_v20 = vld.sshfl [vmem:[%s4467_s12 + $0xc] sm:$0x3 pattern:$0x76325410]  ;;  %vm3513_vm9 = vcmask 261120   ;;  %s4352_s23 = smov [#allocation3]  }
  0x1b   : > { %3902 = vmatmul.mubr.msk.bf16.vlgmr.msra.gmra.mxu0 %vm438_vm2, %v4210_v16  ;;  %v3683_v23 = vld.sshfl [vmem:[%s4467_s12 + $0x10] sm:$0x33 pattern:$0x76325410] }
  0x1c   : > { %v512_v21 = vrot.slane %v504_v17, %v511_v13  ;;  %v519_v22 = vrot.slane %v505_v18, %v511_v13  ;;  %v521_v24 = vcombine.low %v375_v19, %v3682_v20  ;;  %v390_v25 = vcombine.high %v3683_v23, %v3683_v23  ;;  %3925 = vmatprep.mubr.msk.f32.mxu0 %vm4340_vm1, %v4339_v1  ;;  %v3685_v27 = vld.sshfl [vmem:[%s4467_s12 + $0x18] sm:$0x33 pattern:$0x76325410] }
  0x1d   : > { %v3684_v30 = vld.sshfl [vmem:[%s4467_s12 + $0x14] sm:$0x3 pattern:$0x76325410]  ;;  %v405_v31 = vcombine.high %v3685_v27, %v3685_v27 }
  0x1e   : > { %v520_v26 = vcombine.low %v512_v21, %v519_v22  ;;  %v522_v28 = vcombine.low %v3683_v23, %v390_v25  ;;  %v529_v29 = vrot.slane %v521_v24, %v511_v13  ;;  %v3686_v33 = vld.sshfl [vmem:[%s4467_s12 + $0x1c] sm:$0x3 pattern:$0x76325410]  ;;  %v538_v35 = vcombine.low %v3684_v30, %v3685_v27  ;;  %s4347_s12 = smov 104  }
  0x1f   : > { %v539_v36 = vcombine.low %v405_v31, %v3686_v33 }
  0x20   : > { %3910 = vmatmul.mubr.msk.bf16.vlgmr.msra.gmra.mxu1 %vm564_vm3, %v520_v26  ;;  %v536_v32 = vrot.slane %v522_v28, %v511_v13  ;;  %v546_v37 = vrot.slane %v538_v35, %v511_v13 }
  0x21   : > { %3913 = vmatprep.mubr.msk.bf16.mxu1 %vm4340_vm1, %v4339_v1  ;;  %v553_v38 = vrot.slane %v539_v36, %v511_v13 }
  0x22   : > { %v537_v34 = vcombine.low %v529_v29, %v536_v32 }
  0x23   : > { %v554_v39 = vcombine.low %v546_v37, %v553_v38 }
  0x28   : > { %3914 = vmatmul.mubr.msk.bf16.gmra.mxu1 %vm564_vm3, %v537_v34 }
  0x29   : > { %3917 = vmatprep.mubr.msk.bf16.mxu1 %vm4340_vm1, %v4339_v1 }
  0x30   : > { %3918 = vmatmul.mubr.msk.bf16.gmra.mxu1 %vm564_vm3, %v554_v39 }
  0x31   : > { %3946 = vmatprep.mubr.msk.f32.mxu1 %vm4340_vm1, %v4339_v1 }
  0xdb   : > { %v3903_v48 = vpop.f32.mrf.mxu0 }
  0xdc   : > { %v4563_v13 = vadd.f32 %v3903_v48, %v3687_v50 }
  0xdd   : > { %v479_v53 = vpop.f32.mrf.mxu0 }
  0xde   : > { %v4508_v55 = vadd.f32 %v3687_v50, %v479_v53 }
  0xdf   : > { %v3904_v60 = vpop.f32.mrf.mxu0 }
  0xe0   : > { %v612_v41 = vpop.f32.mrf.mxu1  ;;  %v4568_v14 = vadd.f32 %v3904_v60, %v3687_v50 }
  0xe1   : > { %v613_v42 = vadd.f32 %v3693_v40, %v612_v41  ;;  %v482_v3 = vpop.f32.mrf.mxu0 }
  0xe2   : > { %v3911_v43 = vpop.f32.mrf.mxu1  ;;  %v4540_v8 = vadd.f32 %v3687_v50, %v482_v3 }
  0xe3   : > { %v641_v44 = vcombine.high %v613_v42, %v613_v42 }
  0xe4   : > { %v615_v45 = vpop.f32.mrf.mxu1 }
  0xe5   : > { %v4494_v46 = vcombine.low %v613_v42, %v641_v44  ;;  %v4496_v47 = vadd.f32 %v3693_v40, %v615_v45 }
  0xe6   : > { %v3912_v49 = vpop.f32.mrf.mxu1 }
  0xe7   : > { %1005 = vrot.lane.b32.xlu1 %v4494_v46, %s4342_s21  ;;  %1007 = vrot.lane.b32.xlu0 %v4496_v47, %s4342_s21  ;;  %v642_v58 = vcombine.high %v4496_v47, %v4496_v47 }
  0xe8   : > { %3922 = vmatpush3.xpose.msk.msra.mxu0 %vm648_vm4, %v4496_v47  ;;  %v620_v51 = vpop.f32.mrf.mxu1 }
  0xe9   : > { %v621_v52 = vadd.f32 %v3693_v40, %v620_v51  ;;  %3923 = vmatprep.subr.mxu0 %v4339_v1 }
  0xea   : > { %v3915_v54 = vpop.f32.mrf.mxu1 }
  0xeb   : > { %v4510_v56 = vcombine.high %v621_v52, %v621_v52  ;;  %v4519_v62 = vcombine.low %v642_v58, %v621_v52 }
  0xec   : > { %3924 = vmatpush3.xpose.msk.msra.mxu0 %vm648_vm4, %v4494_v46  ;;  %v623_v57 = vpop.f32.mrf.mxu1 }
  0xed   : > { %v624_v59 = vadd.f32 %v3693_v40, %v623_v57  ;;  %1087 = vrot.lane.b32.xlu1 %v4510_v56, %s4342_s21  ;;  %3928 = vmatprep.subr.mxu0 %v4339_v1 }
  0xee   : > { %v3916_v61 = vpop.f32.mrf.mxu1 }
  0xef   : > { %v644_v63 = vcombine.high %v624_v59, %v624_v59  ;;  %3926 = vmatmul.mubr.msk.f32.vlgmr.msra.gmra.mxu0 %vm648_vm4, %v4508_v55 }
  0xf0   : > { %3929 = vmatpush3.xpose.msk.msra.mxu0 %vm648_vm4, %v4510_v56  ;;  %v628_v0 = vpop.f32.mrf.mxu1  ;;  %3932 = vmatprep.mubr.msk.f32.mxu0 %vm4340_vm1, %v4339_v1 }
  0xf1   : > { %v4527_v2 = vadd.f32 %v3693_v40, %v628_v0  ;;  %1085 = vrot.lane.b32.xlu1 %v4519_v62, %s4342_s21  ;;  %3930 = vmatprep.subr.mxu0 %v4339_v1  ;;  %v4532_v5 = vcombine.low %v624_v59, %v644_v63 }
  0xf2   : > { %v3919_v4 = vpop.f32.mrf.mxu1 }
  0xf3   : > { %1167 = vrot.lane.b32.xlu0 %v4527_v2, %s4342_s21  ;;  %v645_v7 = vcombine.high %v4527_v2, %v4527_v2 }
  0xf4   : > { %3931 = vmatpush3.xpose.msk.msra.mxu0 %vm648_vm4, %v4519_v62  ;;  %v631_v6 = vpop.f32.mrf.mxu1 }
  0xf5   : > { %v632_v9 = vadd.f32 %v3693_v40, %v631_v6  ;;  %1165 = vrot.lane.b32.xlu1 %v4532_v5, %s4342_s21  ;;  %3935 = vmatprep.subr.mxu0 %v4339_v1 }
  0xf6   : > { %v3920_v10 = vpop.f32.mrf.mxu1 }
  0xf7   : > { %v4545_v11 = vcombine.high %v632_v9, %v632_v9  ;;  %3933 = vmatmul.mubr.msk.f32.vlgmr.msra.gmra.mxu0 %vm648_vm4, %v4540_v8  ;;  %v4549_v12 = vcombine.low %v645_v7, %v632_v9 }
  0xf8   : > { %3936 = vmatpush3.xpose.msk.msra.mxu0 %vm648_vm4, %v4527_v2  ;;  %3939 = vmatprep.mubr.msk.f32.mxu0 %vm4340_vm1, %v4339_v1 }
  0xf9   : > { %3943 = vmatpush3.xpose.msk.msra.mxu1 %vm648_vm4, %v4545_v11  ;;  %3937 = vmatprep.subr.mxu0 %v4339_v1 }
  0xfa   : > { %3944 = vmatprep.subr.mxu1 %v4339_v1  ;;  %1245 = vrot.lane.b32.xlu1 %v4549_v12, %s4342_s21 }
  0xfc   : > { %3938 = vmatpush3.xpose.msk.msra.mxu0 %vm648_vm4, %v4532_v5 }
  0xfd   : > { %3945 = vmatpush3.xpose.msk.msra.mxu1 %vm648_vm4, %v4549_v12  ;;  %3949 = vmatprep.subr.mxu0 %v4339_v1 }
  0xfe   : > { %3977 = vmatprep.subr.mxu1 %v4339_v1 }
  0xff   : > { %3940 = vmatmul.mubr.msk.f32.vlgmr.msra.gmra.mxu0 %vm648_vm4, %v4563_v13 }
 0x100   : > { %3947 = vmatmul.mubr.msk.f32.vlgmr.msra.gmra.mxu1 %vm648_vm4, %v4568_v14  ;;  %3953 = vmatprep.mubr.msk.f32.mxu0 %vm4340_vm1, %v4339_v1 }
 0x101   : > { %3981 = vmatprep.mubr.msk.f32.mxu1 %vm4340_vm1, %v4339_v1 }
 0x159   : > { %v1008_v15 = vpop.permute.xlu0 %1007  ;;  %v1006_v16 = vpop.permute.xlu1 %1005 }
 0x15a   : > { %3950 = vmatpush3.msk.msra.mxu0 %vm574_vm0, %v1008_v15 }
 0x15b   : > { %3951 = vmatprep.subr.mxu0 %v4339_v1 }
 0x15c   : > { %3952 = vmatpush3.msra.mxu0 %v1006_v16 }
 0x15d   : > { %3956 = vmatprep.subr.mxu0 %v4339_v1 }
 0x15f   : > { %v1088_v38 = vpop.permute.xlu1 %1087 }
 0x163   : > { %v1086_v41 = vpop.permute.xlu1 %1085 }
 0x165   : > { %v4590_v29 = vpop.permute.xlu0 %1167 }
 0x167   : > { %v1166_v42 = vpop.permute.xlu1 %1165 }
 0x16c   : > { %v4594_v43 = vpop.permute.xlu1 %1245 }
 0x1af   : > { %v722_v17 = vpop.f32.mrf.mxu0 }
 0x1b0   : > { %v961_v18 = vsel %vm960_vm5, %v722_v17, -inf }
 0x1b1   : > { %962 = vmax.xlane.f32.xlu0 %v961_v18  ;;  %v3927_v19 = vpop.f32.mrf.mxu0 }
 0x1b7   : > { %v800_v20 = vpop.f32.mrf.mxu0 }
 0x1b8   : > { %v964_v21 = vsel %vm960_vm5, %v800_v20, -inf }
 0x1b9   : > { %965 = vmax.xlane.f32.xlu0 %v964_v21  ;;  %v3934_v22 = vpop.f32.mrf.mxu0 }
 0x1bf   : > { %v878_v23 = vpop.f32.mrf.mxu0 }
 0x1c0   : > { %v956_v24 = vpop.f32.mrf.mxu1  ;;  %v967_v25 = vsel %vm960_vm5, %v878_v23, -inf }
 0x1c1   : > { %968 = vmax.xlane.f32.xlu1 %v967_v25  ;;  %v3941_v26 = vpop.f32.mrf.mxu0  ;;  %v970_v28 = vsel %vm960_vm5, %v956_v24, -inf }
 0x1c2   : > { %v3948_v27 = vpop.f32.mrf.mxu1 }
 0x1c5   : > { %971 = vmax.xlane.f32.xlu1 %v970_v28 }
 0x1cf   : > { %1247 = vrot.lane.b32.xlu0 %v4545_v11, %s4342_s21 }
 0x1d6   : > { %1419 = vrot.lane.b32.xlu1 %v4510_v56, %s4343_s24 }
 0x23a   : > { %v963_v30 = vpop.xlane.xlu0 %962 }
 0x23b   : > { %v973_v31 = vsub.f32 %v722_v17, %v963_v30 }
 0x23d   : > { %v977_v32 = vmul.f32 1.442695, %v973_v31 }
 0x23f   : > { %4213 = vpow2.f32 %v977_v32 }
 0x242   : > { %v966_v33 = vpop.xlane.xlu0 %965 }
 0x243   : > { %v974_v34 = vsub.f32 %v800_v20, %v966_v33 }
 0x245   : > { %v979_v35 = vmul.f32 1.442695, %v974_v34 }
 0x246   : > { %v1248_v58 = vpop.permute.xlu0 %1247 }
 0x247   : > { %4215 = vpow2.f32 %v979_v35 }
 0x24a   : > { %v969_v44 = vpop.xlane.xlu1 %968 }
 0x24b   : > { %v975_v45 = vsub.f32 %v878_v23, %v969_v44 }
 0x24c   : > { %v4214_v36 = vpop.eup %4213 }
 0x24d   : > { %v985_v37 = vsel %vm960_vm5, %v4214_v36, 0.0  ;;  %v981_v48 = vmul.f32 1.442695, %v975_v45 }
 0x24e   : > { %986 = vadd.xlane.f32.xlu0 %v985_v37  ;;  %v972_v49 = vpop.xlane.xlu1 %971 }
 0x24f   : > { %4217 = vpow2.f32 %v981_v48  ;;  %v976_v50 = vsub.f32 %v956_v24, %v972_v49 }
 0x251   : > { %v983_v51 = vmul.f32 1.442695, %v976_v50 }
 0x252   : > { %v1420_v60 = vpop.permute.xlu1 %1419 }
 0x253   : > { %4219 = vpow2.f32 %v983_v51 }
 0x254   : > { %v4216_v39 = vpop.eup %4215 }
 0x255   : > { %v988_v40 = vsel %vm960_vm5, %v4216_v39, 0.0 }
 0x256   : > { %989 = vadd.xlane.f32.xlu1 %v988_v40 }
 0x25c   : > { %v4218_v52 = vpop.eup %4217 }
 0x25d   : > { %v991_v53 = vsel %vm960_vm5, %v4218_v52, 0.0 }
 0x260   : > { %v4603_v54 = vpop.eup %4219 }
 0x261   : > { %v994_v57 = vsel %vm960_vm5, %v4603_v54, 0.0 }
 0x264   : > { %1337 = vrot.lane.b32.xlu0 %v4496_v47, %s4343_s24 }
 0x267   : > { %1417 = vrot.lane.b32.xlu1 %v4519_v62, %s4343_s24 }
 0x26b   : > { %1415 = vrot.lane.b32.xlu1 %v4540_v8, %s4343_s24 }
 0x283   : > { %992 = vadd.xlane.f32.xlu0 %v991_v53 }
 0x28f   : > { %995 = vadd.xlane.f32.xlu1 %v994_v57 }
 0x299   : > { %1335 = vrot.lane.b32.xlu0 %v4494_v46, %s4343_s24 }
 0x29d   : > { %1333 = vrot.lane.b32.xlu0 %v4508_v55, %s4343_s24 }
 0x2a0   : > { %1583 = vrot.lane.b32.xlu1 %v4545_v11, %s4343_s24 }
 0x2a1   : > { %1501 = vrot.lane.b32.xlu0 %v4527_v2, %s4343_s24 }
 0x2a4   : > { %1581 = vrot.lane.b32.xlu1 %v4549_v12, %s4343_s24 }
 0x2a5   : > { %1499 = vrot.lane.b32.xlu0 %v4532_v5, %s4343_s24 }
 0x2a8   : > { %1579 = vrot.lane.b32.xlu1 %v4568_v14, %s4343_s24 }
 0x2a9   : > { %1497 = vrot.lane.b32.xlu0 %v4563_v13, %s4343_s24  ;;  %s315_s24 = sand.u32 1, %s4329_s28  }
 0x2d7   : > { %v987_v59 = vpop.xlane.xlu0 %986 }
 0x2d8   : > { %4221 = vrcp.f32 %v987_v59 }
 0x2db   : > { %v1338_v61 = vpop.permute.xlu0 %1337 }
 0x2dc   : > { %3978 = vmatpush3.xpose.msk.msra.mxu1 %vm648_vm4, %v1338_v61 }
 0x2dd   : > { %3979 = vmatprep.subr.mxu1 %v4339_v1 }
 0x2df   : > { %v990_v63 = vpop.xlane.xlu1 %989 }
 0x2e0   : > { %4223 = vrcp.f32 %v990_v63 }
 0x2e3   : > { %v1418_v9 = vpop.permute.xlu1 %1417 }
 0x2e5   : > { %v4222_v0 = vpop.eup %4221 }
 0x2e6   : > { %v1001_v3 = vmul.f32 %v4222_v0, %v4214_v36 }
 0x2e7   : > { %v1416_v15 = vpop.permute.xlu1 %1415 }
 0x2e8   : > { %3954 = vmatmul.mubr.msk.f32.vlgmr.msra.gmra.mxu0 %vm960_vm5, %v1001_v3 }
 0x2e9   : > { %3957 = vmatpush3.msk.msra.mxu0 %vm574_vm0, %v1088_v38  ;;  %3960 = vmatprep.mubr.msk.f32.mxu0 %vm4340_vm1, %v4339_v1 }
 0x2ea   : > { %3958 = vmatprep.subr.mxu0 %v4339_v1 }
 0x2eb   : > { %3959 = vmatpush3.msra.mxu0 %v1086_v41 }
 0x2ec   : > { %3963 = vmatprep.subr.mxu0 %v4339_v1 }
 0x2ed   : > { %v4224_v4 = vpop.eup %4223 }
 0x2ee   : > { %v1002_v6 = vmul.f32 %v4224_v4, %v4216_v39 }
 0x2f0   : > { %3961 = vmatmul.mubr.msk.f32.vlgmr.msra.gmra.mxu0 %vm960_vm5, %v1002_v6 }
 0x2f1   : > { %3964 = vmatpush3.msk.msra.mxu0 %vm574_vm0, %v4590_v29  ;;  %3967 = vmatprep.mubr.msk.f32.mxu0 %vm4340_vm1, %v4339_v1 }
 0x2f2   : > { %3965 = vmatprep.subr.mxu0 %v4339_v1 }
 0x2f3   : > { %3966 = vmatpush3.msra.mxu0 %v1166_v42 }
 0x2f4   : > { %3970 = vmatprep.subr.mxu0 %v4339_v1 }
 0x30c   : > { %v993_v7 = vpop.xlane.xlu0 %992 }
 0x30d   : > { %4225 = vrcp.f32 %v993_v7 }
 0x310   : > { %v1336_v10 = vpop.permute.xlu0 %1335 }
 0x311   : > { %3980 = vmatpush3.xpose.msk.msra.mxu1 %vm648_vm4, %v1336_v10 }
 0x312   : > { %3991 = vmatprep.subr.mxu1 %v4339_v1 }
 0x314   : > { %v1334_v16 = vpop.permute.xlu0 %1333 }
 0x315   : > { %3982 = vmatmul.mubr.msk.f32.vlgmr.msra.gmra.mxu1 %vm648_vm4, %v1334_v16 }
 0x316   : > { %3995 = vmatprep.mubr.msk.f32.mxu1 %vm4340_vm1, %v4339_v1 }
 0x318   : > { %v1502_v17 = vpop.permute.xlu0 %1501  ;;  %v996_v18 = vpop.xlane.xlu1 %995 }
 0x319   : > { %4227 = vrcp.f32 %v996_v18  ;;  %3992 = vmatpush3.xpose.msk.msra.mxu1 %vm648_vm4, %v1502_v17 }
 0x31a   : > { %v4226_v19 = vpop.eup %4225  ;;  %3993 = vmatprep.subr.mxu1 %v4339_v1 }
 0x31b   : > { %v1003_v20 = vmul.f32 %v4226_v19, %v4218_v52 }
 0x31c   : > { %v1500_v21 = vpop.permute.xlu0 %1499  ;;  %v1584_v25 = vpop.permute.xlu1 %1583 }
 0x31d   : > { %3968 = vmatmul.mubr.msk.f32.vlgmr.msra.gmra.mxu0 %vm960_vm5, %v1003_v20  ;;  %3994 = vmatpush3.xpose.msk.msra.mxu1 %vm648_vm4, %v1500_v21 }
 0x31e   : > { %3971 = vmatpush3.msk.msra.mxu0 %vm574_vm0, %v1248_v58  ;;  %3974 = vmatprep.mubr.msk.f32.mxu0 %vm4340_vm1, %v4339_v1 }
 0x31f   : > { %3972 = vmatprep.subr.mxu0 %v4339_v1  ;;  %4005 = vmatprep.subr.mxu1 %v4339_v1 }
 0x320   : > { %3973 = vmatpush3.msra.mxu0 %v4594_v43  ;;  %v1498_v22 = vpop.permute.xlu0 %1497  ;;  %v1582_v26 = vpop.permute.xlu1 %1581 }
 0x321   : > { %3996 = vmatmul.mubr.msk.f32.vlgmr.msra.gmra.mxu1 %vm648_vm4, %v1498_v22  ;;  %3984 = vmatprep.subr.mxu0 %v4339_v1 }
 0x322   : > { %4009 = vmatprep.mubr.msk.f32.mxu1 %vm4340_vm1, %v4339_v1 }
 0x324   : > { %v1580_v27 = vpop.permute.xlu1 %1579 }
 0x326   : > { %v4228_v23 = vpop.eup %4227 }
 0x327   : > { %v1004_v24 = vmul.f32 %v4228_v23, %v4603_v54 }
 0x329   : > { %3975 = vmatmul.mubr.msk.f32.vlgmr.msra.gmra.mxu0 %vm960_vm5, %v1004_v24 }
 0x32a   : > { %3985 = vmatpush3.xpose.msk.msra.mxu0 %vm648_vm4, %v1420_v60  ;;  %3988 = vmatprep.mubr.msk.f32.mxu0 %vm4340_vm1, %v4339_v1 }
 0x32b   : > { %3986 = vmatprep.subr.mxu0 %v4339_v1 }
 0x32e   : > { %3987 = vmatpush3.xpose.msk.msra.mxu0 %vm648_vm4, %v1418_v9 }
 0x32f   : > { %3998 = vmatprep.subr.mxu0 %v4339_v1 }
 0x331   : > { %3989 = vmatmul.mubr.msk.f32.vlgmr.msra.gmra.mxu0 %vm648_vm4, %v1416_v15 }
 0x332   : > { %3999 = vmatpush3.xpose.msk.msra.mxu0 %vm648_vm4, %v1584_v25  ;;  %4002 = vmatprep.mubr.msk.f32.mxu0 %vm4340_vm1, %v4339_v1 }
 0x333   : > { %4000 = vmatprep.subr.mxu0 %v4339_v1 }
 0x336   : > { %4001 = vmatpush3.xpose.msk.msra.mxu0 %vm648_vm4, %v1582_v26 }
 0x337   : > { %4012 = vmatprep.subr.mxu0 %v4339_v1 }
 0x339   : > { %4003 = vmatmul.mubr.msk.f32.vlgmr.msra.gmra.mxu0 %vm648_vm4, %v1580_v27 }
 0x33a   : > { %4016 = vmatprep.mubr.msk.f32.mxu0 %vm4340_vm1, %v4339_v1 }
 0x3a8   : > { %v1081_v28 = vpop.f32.mrf.mxu0 }
 0x3a9   : > { %v1325_v29 = vadd.f32 %v1081_v28, %v4508_v55 }
 0x3aa   : > { %v3955_v30 = vpop.f32.mrf.mxu0 }
 0x3ab   : > { %1329 = vst.msk [vmem:[#allocation2] sm:$0xff] %vm648_vm4, %v1325_v29 }
 0x3b0   : > { %v1161_v31 = vpop.f32.mrf.mxu0 }
 0x3b1   : > { %v1326_v32 = vadd.f32 %v1161_v31, %v4540_v8 }
 0x3b2   : > { %v3962_v33 = vpop.f32.mrf.mxu0 }
 0x3b3   : > { %1330 = vst.msk [vmem:[#allocation2 + $0x8] sm:$0xff] %vm648_vm4, %v1326_v32 }
 0x3d5   : > { %v1411_v34 = vpop.f32.mrf.mxu1 }
 0x3d6   : > { %v1661_v35 = vsel %vm960_vm5, %v1411_v34, -inf }
 0x3d7   : > { %1662 = vmax.xlane.f32.xlu0 %v1661_v35  ;;  %v3983_v36 = vpop.f32.mrf.mxu1 }
 0x3dd   : > { %v1241_v37 = vpop.f32.mrf.mxu0 }
 0x3de   : > { %v1327_v38 = vadd.f32 %v1241_v37, %v4563_v13 }
 0x3df   : > { %v3969_v39 = vpop.f32.mrf.mxu0 }
 0x3e0   : > { %1331 = vst.msk [vmem:[#allocation2 + $0x10] sm:$0xff] %vm648_vm4, %v1327_v38 }
 0x3e1   : > { %v1575_v40 = vpop.f32.mrf.mxu1 }
 0x3e2   : > { %v1667_v41 = vsel %vm960_vm5, %v1575_v40, -inf }
 0x3e3   : > { %1668 = vmax.xlane.f32.xlu0 %v1667_v41  ;;  %v3997_v42 = vpop.f32.mrf.mxu1 }
 0x3e9   : > { %v1321_v43 = vpop.f32.mrf.mxu0 }
 0x3ea   : > { %v1328_v44 = vadd.f32 %v1321_v43, %v4568_v14 }
 0x3eb   : > { %v3976_v45 = vpop.f32.mrf.mxu0 }
 0x3ec   : > { %1332 = vst.msk [vmem:[#allocation2 + $0x18] sm:$0xff] %vm648_vm4, %v1328_v44 }
 0x3f1   : > { %v1493_v48 = vpop.f32.mrf.mxu0 }
 0x3f2   : > { %v1664_v49 = vsel %vm960_vm5, %v1493_v48, -inf }
 0x3f3   : > { %1665 = vmax.xlane.f32.xlu1 %v1664_v49  ;;  %v3990_v50 = vpop.f32.mrf.mxu0 }
 0x3f9   : > { %v1657_v51 = vpop.f32.mrf.mxu0 }
 0x3fa   : > { %v1670_v52 = vsel %vm960_vm5, %v1657_v51, -inf }
 0x3fb   : > { %1671 = vmax.xlane.f32.xlu0 %v1670_v52  ;;  %v4004_v53 = vpop.f32.mrf.mxu0 }
 0x404   : > { %1787 = vrot.lane.b32.xlu1 %v4510_v56, %s4344_s25 }
 0x408   : > { %1705 = vrot.lane.b32.xlu1 %v4494_v46, %s4344_s25 }
 0x40c   : > { %1785 = vrot.lane.b32.xlu1 %v4519_v62, %s4344_s25 }
 0x410   : > { %1947 = vrot.lane.b32.xlu1 %v4545_v11, %s4344_s25 }
 0x414   : > { %1945 = vrot.lane.b32.xlu1 %v4549_v12, %s4344_s25 }
 0x418   : > { %2136 = vrot.lane.b32.xlu1 %v4510_v56, %s4345_s26 }
 0x41c   : > { %2134 = vrot.lane.b32.xlu1 %v4519_v62, %s4345_s26 }
 0x420   : > { %2132 = vrot.lane.b32.xlu1 %v4540_v8, %s4345_s26 }
 0x460   : > { %v1663_v54 = vpop.xlane.xlu0 %1662 }
 0x461   : > { %v1673_v57 = vsub.f32 %v1411_v34, %v1663_v54 }
 0x463   : > { %v1677_v58 = vmul.f32 1.442695, %v1673_v57 }
 0x465   : > { %4229 = vpow2.f32 %v1677_v58 }
 0x46c   : > { %v1669_v59 = vpop.xlane.xlu0 %1668 }
 0x46d   : > { %v1675_v60 = vsub.f32 %v1575_v40, %v1669_v59 }
 0x46f   : > { %v1681_v61 = vmul.f32 1.442695, %v1675_v60 }
 0x471   : > { %4231 = vpow2.f32 %v1681_v61 }
 0x472   : > { %v4230_v63 = vpop.eup %4229 }
 0x473   : > { %v1685_v0 = vsel %vm960_vm5, %v4230_v63, 0.0 }
 0x474   : > { %1686 = vadd.xlane.f32.xlu0 %v1685_v0 }
 0x47c   : > { %v1666_v3 = vpop.xlane.xlu1 %1665 }
 0x47d   : > { %v1674_v4 = vsub.f32 %v1493_v48, %v1666_v3 }
 0x47e   : > { %v4232_v6 = vpop.eup %4231 }
 0x47f   : > { %v1679_v7 = vmul.f32 1.442695, %v1674_v4  ;;  %v1691_v9 = vsel %vm960_vm5, %v4232_v6, 0.0 }
 0x480   : > { %v1788_v10 = vpop.permute.xlu1 %1787  ;;  %1692 = vadd.xlane.f32.xlu0 %v1691_v9 }
 0x481   : > { %4233 = vpow2.f32 %v1679_v7  ;;  %4013 = vmatpush3.msk.msra.mxu0 %vm574_vm0, %v1788_v10 }
 0x482   : > { %4014 = vmatprep.subr.mxu0 %v4339_v1 }
 0x484   : > { %v1706_v15 = vpop.permute.xlu1 %1705  ;;  %v1672_v16 = vpop.xlane.xlu0 %1671 }
 0x485   : > { %v1676_v17 = vsub.f32 %v1657_v51, %v1672_v16 }
 0x487   : > { %v1683_v18 = vmul.f32 1.442695, %v1676_v17 }
 0x488   : > { %v1786_v19 = vpop.permute.xlu1 %1785 }
 0x489   : > { %4235 = vpow2.f32 %v1683_v18  ;;  %4015 = vmatpush3.msra.mxu0 %v1786_v19 }
 0x48a   : > { %4026 = vmatprep.subr.mxu0 %v4339_v1 }
 0x48c   : > { %v1948_v24 = vpop.permute.xlu1 %1947 }
 0x48e   : > { %v4708_v20 = vpop.eup %4233 }
 0x48f   : > { %v1688_v21 = vsel %vm960_vm5, %v4708_v20, 0.0 }
 0x490   : > { %1689 = vadd.xlane.f32.xlu1 %v1688_v21  ;;  %v1946_v26 = vpop.permute.xlu1 %1945 }
 0x494   : > { %v2137_v27 = vpop.permute.xlu1 %2136 }
 0x496   : > { %v4712_v22 = vpop.eup %4235  ;;  %1707 = vrot.lane.b32.xlu0 %v4496_v47, %s4344_s25 }
 0x497   : > { %v1694_v23 = vsel %vm960_vm5, %v4712_v22, 0.0 }
 0x498   : > { %1695 = vadd.xlane.f32.xlu1 %v1694_v23  ;;  %v2135_v31 = vpop.permute.xlu1 %2134 }
 0x49a   : > { %1867 = vrot.lane.b32.xlu0 %v4527_v2, %s4344_s25 }
 0x49c   : > { %v2133_v34 = vpop.permute.xlu1 %2132 }
 0x49e   : > { %1865 = vrot.lane.b32.xlu0 %v4532_v5, %s4344_s25  ;;  %s4281_s25 = sshll.u32 %s4352_s23, 4  ;;  %s4282_s25 = int_to_ptr.vmem [resolvable:$false] %s4281_s25 }
 0x4a2   : > { %2054 = vrot.lane.b32.xlu0 %v4496_v47, %s4345_s26 }
 0x4a6   : > { %2052 = vrot.lane.b32.xlu0 %v4494_v46, %s4345_s26 }
 0x4a9   : > { %2300 = vrot.lane.b32.xlu1 %v4545_v11, %s4345_s26 }
 0x4aa   : > { %2050 = vrot.lane.b32.xlu0 %v4508_v55, %s4345_s26 }
 0x4ad   : > { %2298 = vrot.lane.b32.xlu1 %v4549_v12, %s4345_s26 }
 0x4ae   : > { %2218 = vrot.lane.b32.xlu0 %v4527_v2, %s4345_s26 }
 0x4b1   : > { %2296 = vrot.lane.b32.xlu1 %v4568_v14, %s4345_s26 }
 0x4b2   : > { %2216 = vrot.lane.b32.xlu0 %v4532_v5, %s4345_s26 }
 0x4b6   : > { %2214 = vrot.lane.b32.xlu0 %v4563_v13, %s4345_s26  ;;  %s4283_s26 = scalar_lea.vmem %s4282_s25, 1024 }
 0x4fd   : > { %v1687_v25 = vpop.xlane.xlu0 %1686 }
 0x4fe   : > { %4237 = vrcp.f32 %v1687_v25 }
 0x509   : > { %v1693_v28 = vpop.xlane.xlu0 %1692 }
 0x50a   : > { %4239 = vrcp.f32 %v1693_v28 }
 0x50b   : > { %v4238_v29 = vpop.eup %4237 }
 0x50c   : > { %v1701_v32 = vmul.f32 %v4238_v29, %v4230_v63 }
 0x50d   : > { %v1708_v30 = vpop.permute.xlu0 %1707 }
 0x50e   : > { %4006 = vmatpush3.msk.msra.mxu1 %vm574_vm0, %v1708_v30 }
 0x50f   : > { %4007 = vmatprep.subr.mxu1 %v4339_v1 }
 0x510   : > { %4008 = vmatpush3.msra.mxu1 %v1706_v15 }
 0x511   : > { %4010 = vmatmul.mubr.msk.f32.vlgmr.msra.gmra.mxu1 %vm960_vm5, %v1701_v32  ;;  %4019 = vmatprep.subr.mxu1 %v4339_v1  ;;  %v1868_v33 = vpop.permute.xlu0 %1867 }
 0x512   : > { %4020 = vmatpush3.msk.msra.mxu1 %vm574_vm0, %v1868_v33  ;;  %4023 = vmatprep.mubr.msk.f32.mxu1 %vm4340_vm1, %v4339_v1 }
 0x513   : > { %4021 = vmatprep.subr.mxu1 %v4339_v1 }
 0x515   : > { %v1866_v35 = vpop.permute.xlu0 %1865 }
 0x516   : > { %4022 = vmatpush3.msra.mxu1 %v1866_v35 }
 0x517   : > { %v4240_v36 = vpop.eup %4239  ;;  %4033 = vmatprep.subr.mxu1 %v4339_v1 }
 0x518   : > { %v1703_v37 = vmul.f32 %v4240_v36, %v4232_v6 }
 0x519   : > { %v1690_v38 = vpop.xlane.xlu1 %1689  ;;  %v2055_v39 = vpop.permute.xlu0 %2054 }
 0x51a   : > { %4241 = vrcp.f32 %v1690_v38  ;;  %4024 = vmatmul.mubr.msk.f32.vlgmr.msra.gmra.mxu1 %vm960_vm5, %v1703_v37 }
 0x51b   : > { %4034 = vmatpush3.xpose.msk.msra.mxu1 %vm648_vm4, %v2055_v39  ;;  %4037 = vmatprep.mubr.msk.f32.mxu1 %vm4340_vm1, %v4339_v1 }
 0x51c   : > { %4035 = vmatprep.subr.mxu1 %v4339_v1 }
 0x51d   : > { %v2053_v40 = vpop.permute.xlu0 %2052 }
 0x51f   : > { %4036 = vmatpush3.xpose.msk.msra.mxu1 %vm648_vm4, %v2053_v40 }
 0x520   : > { %4047 = vmatprep.subr.mxu1 %v4339_v1 }
 0x521   : > { %v1696_v41 = vpop.xlane.xlu1 %1695  ;;  %v2051_v42 = vpop.permute.xlu0 %2050 }
 0x522   : > { %4243 = vrcp.f32 %v1696_v41  ;;  %4038 = vmatmul.mubr.msk.f32.vlgmr.msra.gmra.mxu1 %vm648_vm4, %v2051_v42 }
 0x523   : > { %4051 = vmatprep.mubr.msk.f32.mxu1 %vm4340_vm1, %v4339_v1 }
 0x525   : > { %v2219_v43 = vpop.permute.xlu0 %2218  ;;  %v2301_v52 = vpop.permute.xlu1 %2300 }
 0x526   : > { %4048 = vmatpush3.xpose.msk.msra.mxu1 %vm648_vm4, %v2219_v43 }
 0x527   : > { %v4242_v44 = vpop.eup %4241  ;;  %4049 = vmatprep.subr.mxu1 %v4339_v1 }
 0x528   : > { %v1702_v45 = vmul.f32 %v4242_v44, %v4708_v20 }
 0x529   : > { %v2217_v48 = vpop.permute.xlu0 %2216  ;;  %v2299_v53 = vpop.permute.xlu1 %2298 }
 0x52a   : > { %4017 = vmatmul.mubr.msk.f32.vlgmr.msra.gmra.mxu0 %vm960_vm5, %v1702_v45  ;;  %4050 = vmatpush3.xpose.msk.msra.mxu1 %vm648_vm4, %v2217_v48 }
 0x52b   : > { %4027 = vmatpush3.msk.msra.mxu0 %vm574_vm0, %v1948_v24  ;;  %4030 = vmatprep.mubr.msk.f32.mxu0 %vm4340_vm1, %v4339_v1 }
 0x52c   : > { %4028 = vmatprep.subr.mxu0 %v4339_v1  ;;  %4061 = vmatprep.subr.mxu1 %v4339_v1 }
 0x52d   : > { %4029 = vmatpush3.msra.mxu0 %v1946_v26  ;;  %v2215_v49 = vpop.permute.xlu0 %2214  ;;  %v2297_v54 = vpop.permute.xlu1 %2296 }
 0x52e   : > { %4052 = vmatmul.mubr.msk.f32.vlgmr.msra.gmra.mxu1 %vm648_vm4, %v2215_v49  ;;  %4040 = vmatprep.subr.mxu0 %v4339_v1 }
 0x52f   : > { %v4244_v50 = vpop.eup %4243  ;;  %4065 = vmatprep.mubr.msk.f32.mxu1 %vm4340_vm1, %v4339_v1 }
 0x530   : > { %v1704_v51 = vmul.f32 %v4244_v50, %v4712_v22 }
 0x532   : > { %4031 = vmatmul.mubr.msk.f32.vlgmr.msra.gmra.mxu0 %vm960_vm5, %v1704_v51 }
 0x533   : > { %4041 = vmatpush3.xpose.msk.msra.mxu0 %vm648_vm4, %v2137_v27  ;;  %4044 = vmatprep.mubr.msk.f32.mxu0 %vm4340_vm1, %v4339_v1 }
 0x534   : > { %4042 = vmatprep.subr.mxu0 %v4339_v1 }
 0x537   : > { %4043 = vmatpush3.xpose.msk.msra.mxu0 %vm648_vm4, %v2135_v31 }
 0x538   : > { %4054 = vmatprep.subr.mxu0 %v4339_v1 }
 0x53a   : > { %4045 = vmatmul.mubr.msk.f32.vlgmr.msra.gmra.mxu0 %vm648_vm4, %v2133_v34 }
 0x53b   : > { %4055 = vmatpush3.xpose.msk.msra.mxu0 %vm648_vm4, %v2301_v52  ;;  %4058 = vmatprep.mubr.msk.f32.mxu0 %vm4340_vm1, %v4339_v1 }
 0x53c   : > { %4056 = vmatprep.subr.mxu0 %v4339_v1 }
 0x53f   : > { %4057 = vmatpush3.xpose.msk.msra.mxu0 %vm648_vm4, %v2299_v53 }
 0x540   : > { %4068 = vmatprep.subr.mxu0 %v4339_v1 }
 0x542   : > { %4059 = vmatmul.mubr.msk.f32.vlgmr.msra.gmra.mxu0 %vm648_vm4, %v2297_v54 }
 0x543   : > { %4072 = vmatprep.mubr.msk.f32.mxu0 %vm4340_vm1, %v4339_v1 }
 0x5d1   : > { %v4791_v57 = vpop.f32.mrf.mxu1 }
 0x5d3   : > { %v4011_v58 = vpop.f32.mrf.mxu1 }
 0x5da   : > { %v4793_v59 = vpop.f32.mrf.mxu1 }
 0x5dc   : > { %v4025_v60 = vpop.f32.mrf.mxu1 }
 0x5e2   : > { %v2128_v61 = vpop.f32.mrf.mxu1 }
 0x5e3   : > { %v2378_v63 = vsel %vm960_vm5, %v2128_v61, -inf }
 0x5e4   : > { %2379 = vmax.xlane.f32.xlu0 %v2378_v63  ;;  %v4039_v0 = vpop.f32.mrf.mxu1 }
 0x5ea   : > { %v4796_v3 = vpop.f32.mrf.mxu0 }
 0x5ec   : > { %v4018_v4 = vpop.f32.mrf.mxu0 }
 0x5ee   : > { %v2292_v6 = vpop.f32.mrf.mxu1 }
 0x5ef   : > { %v2384_v7 = vsel %vm960_vm5, %v2292_v6, -inf }
 0x5f0   : > { %2385 = vmax.xlane.f32.xlu0 %v2384_v7  ;;  %v4053_v9 = vpop.f32.mrf.mxu1 }
 0x5f2   : > { %v4799_v10 = vpop.f32.mrf.mxu0 }
 0x5f4   : > { %v4032_v15 = vpop.f32.mrf.mxu0 }
 0x5fa   : > { %v2210_v16 = vpop.f32.mrf.mxu0 }
 0x5fb   : > { %v2381_v17 = vsel %vm960_vm5, %v2210_v16, -inf }
 0x5fc   : > { %2382 = vmax.xlane.f32.xlu1 %v2381_v17  ;;  %v4046_v18 = vpop.f32.mrf.mxu0 }
 0x602   : > { %v2374_v19 = vpop.f32.mrf.mxu0 }
 0x603   : > { %v2387_v20 = vsel %vm960_vm5, %v2374_v19, -inf }
 0x604   : > { %2388 = vmax.xlane.f32.xlu0 %v2387_v20  ;;  %v4060_v21 = vpop.f32.mrf.mxu0 }
 0x60d   : > { %2504 = vrot.lane.b32.xlu1 %v4510_v56, %s4346_s10 }
 0x611   : > { %2422 = vrot.lane.b32.xlu1 %v4494_v46, %s4346_s10 }
 0x615   : > { %2502 = vrot.lane.b32.xlu1 %v4519_v62, %s4346_s10 }
 0x619   : > { %2664 = vrot.lane.b32.xlu1 %v4545_v11, %s4346_s10 }
 0x61d   : > { %2662 = vrot.lane.b32.xlu1 %v4549_v12, %s4346_s10 }
 0x621   : > { %2853 = vrot.lane.b32.xlu1 %v4510_v56, %s4347_s12 }
 0x625   : > { %2851 = vrot.lane.b32.xlu1 %v4519_v62, %s4347_s12 }
 0x629   : > { %2849 = vrot.lane.b32.xlu1 %v4540_v8, %s4347_s12 }
 0x66d   : > { %v2380_v22 = vpop.xlane.xlu0 %2379 }
 0x66e   : > { %v2390_v23 = vsub.f32 %v2128_v61, %v2380_v22 }
 0x670   : > { %v2394_v24 = vmul.f32 1.442695, %v2390_v23 }
 0x672   : > { %4245 = vpow2.f32 %v2394_v24 }
 0x679   : > { %v2386_v25 = vpop.xlane.xlu0 %2385 }
 0x67a   : > { %v2392_v26 = vsub.f32 %v2292_v6, %v2386_v25 }
 0x67c   : > { %v2398_v27 = vmul.f32 1.442695, %v2392_v26 }
 0x67e   : > { %4247 = vpow2.f32 %v2398_v27 }
 0x67f   : > { %v4246_v28 = vpop.eup %4245 }
 0x680   : > { %v2402_v29 = vsel %vm960_vm5, %v4246_v28, 0.0 }
 0x681   : > { %2403 = vadd.xlane.f32.xlu0 %v2402_v29 }
 0x685   : > { %v2383_v30 = vpop.xlane.xlu1 %2382 }
 0x686   : > { %v2391_v31 = vsub.f32 %v2210_v16, %v2383_v30 }
 0x688   : > { %v2396_v32 = vmul.f32 1.442695, %v2391_v31 }
 0x689   : > { %v2505_v33 = vpop.permute.xlu1 %2504 }
 0x68a   : > { %4249 = vpow2.f32 %v2396_v32  ;;  %4069 = vmatpush3.msk.msra.mxu0 %vm574_vm0, %v2505_v33 }
 0x68b   : > { %v4248_v34 = vpop.eup %4247  ;;  %4070 = vmatprep.subr.mxu0 %v4339_v1 }
 0x68c   : > { %v2408_v35 = vsel %vm960_vm5, %v4248_v34, 0.0 }
 0x68d   : > { %v2423_v36 = vpop.permute.xlu1 %2422  ;;  %v2389_v37 = vpop.xlane.xlu0 %2388  ;;  %2409 = vadd.xlane.f32.xlu0 %v2408_v35 }
 0x68e   : > { %v2393_v38 = vsub.f32 %v2374_v19, %v2389_v37 }
 0x690   : > { %v2400_v39 = vmul.f32 1.442695, %v2393_v38 }
 0x691   : > { %v2503_v40 = vpop.permute.xlu1 %2502 }
 0x692   : > { %4251 = vpow2.f32 %v2400_v39  ;;  %4071 = vmatpush3.msra.mxu0 %v2503_v40 }
 0x693   : > { %4082 = vmatprep.subr.mxu0 %v4339_v1 }
 0x695   : > { %v2665_v45 = vpop.permute.xlu1 %2664 }
 0x697   : > { %v4250_v41 = vpop.eup %4249 }
 0x698   : > { %v2405_v42 = vsel %vm960_vm5, %v4250_v41, 0.0 }
 0x699   : > { %2406 = vadd.xlane.f32.xlu1 %v2405_v42  ;;  %v2663_v49 = vpop.permute.xlu1 %2662 }
 0x69d   : > { %v2854_v50 = vpop.permute.xlu1 %2853 }
 0x69f   : > { %v4825_v43 = vpop.eup %4251 }
 0x6a0   : > { %v2411_v44 = vsel %vm960_vm5, %v4825_v43, 0.0 }
 0x6a1   : > { %2412 = vadd.xlane.f32.xlu1 %v2411_v44  ;;  %v2852_v52 = vpop.permute.xlu1 %2851 }
 0x6a3   : > { %2424 = vrot.lane.b32.xlu0 %v4496_v47, %s4346_s10 }
 0x6a5   : > { %v2850_v60 = vpop.permute.xlu1 %2849 }
 0x6a7   : > { %2584 = vrot.lane.b32.xlu0 %v4527_v2, %s4346_s10 }
 0x6ab   : > { %2582 = vrot.lane.b32.xlu0 %v4532_v5, %s4346_s10  ;;  %s3673_s10 = sshll.u32 %s315_s24, 5 }
 0x6af   : > { %2771 = vrot.lane.b32.xlu0 %v4496_v47, %s4347_s12 }
 0x6b2   : > { %3017 = vrot.lane.b32.xlu1 %v4545_v11, %s4347_s12 }
 0x6b3   : > { %2769 = vrot.lane.b32.xlu0 %v4494_v46, %s4347_s12 }
 0x6b6   : > { %3015 = vrot.lane.b32.xlu1 %v4549_v12, %s4347_s12 }
 0x6b7   : > { %2767 = vrot.lane.b32.xlu0 %v4508_v55, %s4347_s12 }
 0x6ba   : > { %3013 = vrot.lane.b32.xlu1 %v4568_v14, %s4347_s12 }
 0x6bb   : > { %2935 = vrot.lane.b32.xlu0 %v4527_v2, %s4347_s12 }
 0x6bf   : > { %2933 = vrot.lane.b32.xlu0 %v4532_v5, %s4347_s12 }
 0x6c3   : > { %2931 = vrot.lane.b32.xlu0 %v4563_v13, %s4347_s12  ;;  %s317_s12 = scalar_lea.vmem [#allocation3], %s3673_s10 }
 0x70a   : > { %v2404_v48 = vpop.xlane.xlu0 %2403 }
 0x70b   : > { %4253 = vrcp.f32 %v2404_v48 }
 0x716   : > { %v2410_v51 = vpop.xlane.xlu0 %2409 }
 0x717   : > { %4255 = vrcp.f32 %v2410_v51 }
 0x718   : > { %v4254_v53 = vpop.eup %4253 }
 0x719   : > { %v2418_v58 = vmul.f32 %v4254_v53, %v4246_v28 }
 0x71a   : > { %v2425_v54 = vpop.permute.xlu0 %2424 }
 0x71b   : > { %4062 = vmatpush3.msk.msra.mxu1 %vm574_vm0, %v2425_v54 }
 0x71c   : > { %4063 = vmatprep.subr.mxu1 %v4339_v1 }
 0x71d   : > { %4064 = vmatpush3.msra.mxu1 %v2423_v36 }
 0x71e   : > { %4066 = vmatmul.mubr.msk.f32.vlgmr.msra.gmra.mxu1 %vm960_vm5, %v2418_v58  ;;  %4075 = vmatprep.subr.mxu1 %v4339_v1  ;;  %v2585_v61 = vpop.permute.xlu0 %2584 }
 0x71f   : > { %4076 = vmatpush3.msk.msra.mxu1 %vm574_vm0, %v2585_v61  ;;  %4079 = vmatprep.mubr.msk.f32.mxu1 %vm4340_vm1, %v4339_v1 }
 0x720   : > { %4077 = vmatprep.subr.mxu1 %v4339_v1 }
 0x722   : > { %v2407_v63 = vpop.xlane.xlu1 %2406  ;;  %v2583_v0 = vpop.permute.xlu0 %2582 }
 0x723   : > { %4257 = vrcp.f32 %v2407_v63  ;;  %4078 = vmatpush3.msra.mxu1 %v2583_v0 }
 0x724   : > { %v4256_v4 = vpop.eup %4255  ;;  %4089 = vmatprep.subr.mxu1 %v4339_v1 }
 0x725   : > { %v2420_v6 = vmul.f32 %v4256_v4, %v4248_v34 }
 0x726   : > { %v2772_v7 = vpop.permute.xlu0 %2771 }
 0x727   : > { %4080 = vmatmul.mubr.msk.f32.vlgmr.msra.gmra.mxu1 %vm960_vm5, %v2420_v6 }
 0x728   : > { %4090 = vmatpush3.xpose.msk.msra.mxu1 %vm648_vm4, %v2772_v7  ;;  %4093 = vmatprep.mubr.msk.f32.mxu1 %vm4340_vm1, %v4339_v1 }
 0x729   : > { %4091 = vmatprep.subr.mxu1 %v4339_v1 }
 0x72a   : > { %v2413_v9 = vpop.xlane.xlu1 %2412  ;;  %v2770_v15 = vpop.permute.xlu0 %2769 }
 0x72b   : > { %4259 = vrcp.f32 %v2413_v9 }
 0x72c   : > { %4092 = vmatpush3.xpose.msk.msra.mxu1 %vm648_vm4, %v2770_v15 }
 0x72d   : > { %4103 = vmatprep.subr.mxu1 %v4339_v1 }
 0x72e   : > { %v2768_v16 = vpop.permute.xlu0 %2767  ;;  %v3018_v24 = vpop.permute.xlu1 %3017 }
 0x72f   : > { %4094 = vmatmul.mubr.msk.f32.vlgmr.msra.gmra.mxu1 %vm648_vm4, %v2768_v16 }
 0x730   : > { %v4258_v17 = vpop.eup %4257  ;;  %4107 = vmatprep.mubr.msk.f32.mxu1 %vm4340_vm1, %v4339_v1 }
 0x731   : > { %v2419_v18 = vmul.f32 %v4258_v17, %v4250_v41 }
 0x732   : > { %v2936_v19 = vpop.permute.xlu0 %2935  ;;  %v3016_v25 = vpop.permute.xlu1 %3015 }
 0x733   : > { %4073 = vmatmul.mubr.msk.f32.vlgmr.msra.gmra.mxu0 %vm960_vm5, %v2419_v18  ;;  %4104 = vmatpush3.xpose.msk.msra.mxu1 %vm648_vm4, %v2936_v19 }
 0x734   : > { %4083 = vmatpush3.msk.msra.mxu0 %vm574_vm0, %v2665_v45  ;;  %4105 = vmatprep.subr.mxu1 %v4339_v1 }
 0x735   : > { %4084 = vmatprep.subr.mxu0 %v4339_v1  ;;  %4086 = vmatprep.mubr.msk.f32.mxu0 %vm4340_vm1, %v4339_v1 }
 0x736   : > { %4085 = vmatpush3.msra.mxu0 %v2663_v49  ;;  %v2934_v20 = vpop.permute.xlu0 %2933  ;;  %v3014_v26 = vpop.permute.xlu1 %3013 }
 0x737   : > { %4106 = vmatpush3.xpose.msk.msra.mxu1 %vm648_vm4, %v2934_v20  ;;  %4096 = vmatprep.subr.mxu0 %v4339_v1 }
 0x738   : > { %v4260_v21 = vpop.eup %4259  ;;  %4117 = vmatprep.subr.mxu1 %v4339_v1 }
 0x739   : > { %v2421_v22 = vmul.f32 %v4260_v21, %v4825_v43 }
 0x73a   : > { %v2932_v23 = vpop.permute.xlu0 %2931 }
 0x73b   : > { %4087 = vmatmul.mubr.msk.f32.vlgmr.msra.gmra.mxu0 %vm960_vm5, %v2421_v22  ;;  %4108 = vmatmul.mubr.msk.f32.vlgmr.msra.gmra.mxu1 %vm648_vm4, %v2932_v23 }
 0x73c   : > { %4097 = vmatpush3.xpose.msk.msra.mxu0 %vm648_vm4, %v2854_v50  ;;  %4100 = vmatprep.mubr.msk.f32.mxu0 %vm4340_vm1, %v4339_v1 }
 0x73d   : > { %4098 = vmatprep.subr.mxu0 %v4339_v1  ;;  %4121 = vmatprep.mubr.msk.f32.mxu1 %vm4340_vm1, %v4339_v1 }
 0x740   : > { %4099 = vmatpush3.xpose.msk.msra.mxu0 %vm648_vm4, %v2852_v52 }
 0x741   : > { %4110 = vmatprep.subr.mxu0 %v4339_v1 }
 0x743   : > { %4101 = vmatmul.mubr.msk.f32.vlgmr.msra.gmra.mxu0 %vm648_vm4, %v2850_v60 }
 0x744   : > { %4111 = vmatpush3.xpose.msk.msra.mxu0 %vm648_vm4, %v3018_v24  ;;  %4114 = vmatprep.mubr.msk.f32.mxu0 %vm4340_vm1, %v4339_v1 }
 0x745   : > { %4112 = vmatprep.subr.mxu0 %v4339_v1 }
 0x748   : > { %4113 = vmatpush3.xpose.msk.msra.mxu0 %vm648_vm4, %v3016_v25 }
 0x749   : > { %4124 = vmatprep.subr.mxu0 %v4339_v1 }
 0x74b   : > { %4115 = vmatmul.mubr.msk.f32.vlgmr.msra.gmra.mxu0 %vm648_vm4, %v3014_v26 }
 0x74c   : > { %4128 = vmatprep.mubr.msk.f32.mxu0 %vm4340_vm1, %v4339_v1 }
 0x7de   : > { %v4903_v27 = vpop.f32.mrf.mxu1 }
 0x7e0   : > { %v4067_v28 = vpop.f32.mrf.mxu1 }
 0x7e7   : > { %v4905_v29 = vpop.f32.mrf.mxu1 }
 0x7e9   : > { %v4081_v30 = vpop.f32.mrf.mxu1 }
 0x7ef   : > { %v2845_v31 = vpop.f32.mrf.mxu1 }
 0x7f0   : > { %v3095_v32 = vsel %vm960_vm5, %v2845_v31, -inf }
 0x7f1   : > { %3096 = vmax.xlane.f32.xlu0 %v3095_v32  ;;  %v4095_v33 = vpop.f32.mrf.mxu1 }
 0x7f3   : > { %v4908_v34 = vpop.f32.mrf.mxu0 }
 0x7f5   : > { %v4074_v35 = vpop.f32.mrf.mxu0 }
 0x7fb   : > { %v4910_v36 = vpop.f32.mrf.mxu0  ;;  %v3009_v37 = vpop.f32.mrf.mxu1 }
 0x7fc   : > { %v3101_v38 = vsel %vm960_vm5, %v3009_v37, -inf }
 0x7fd   : > { %v4088_v39 = vpop.f32.mrf.mxu0  ;;  %3102 = vmax.xlane.f32.xlu0 %v3101_v38  ;;  %v4109_v40 = vpop.f32.mrf.mxu1 }
 0x803   : > { %v2927_v41 = vpop.f32.mrf.mxu0 }
 0x804   : > { %v3098_v42 = vsel %vm960_vm5, %v2927_v41, -inf }
 0x805   : > { %3099 = vmax.xlane.f32.xlu1 %v3098_v42  ;;  %v4102_v43 = vpop.f32.mrf.mxu0 }
 0x80b   : > { %v3091_v44 = vpop.f32.mrf.mxu0 }
 0x80c   : > { %v3104_v45 = vsel %vm960_vm5, %v3091_v44, -inf }
 0x80d   : > { %3105 = vmax.xlane.f32.xlu0 %v3104_v45  ;;  %v4116_v48 = vpop.f32.mrf.mxu0 }
 0x816   : > { %3221 = vrot.lane.b32.xlu1 %v4510_v56, %s4348_s13 }
 0x81a   : > { %3139 = vrot.lane.b32.xlu1 %v4494_v46, %s4348_s13 }
 0x81e   : > { %3219 = vrot.lane.b32.xlu1 %v4519_v62, %s4348_s13 }
 0x822   : > { %3381 = vrot.lane.b32.xlu1 %v4545_v11, %s4348_s13 }
 0x87a   : > { %v3097_v49 = vpop.xlane.xlu0 %3096 }
 0x87b   : > { %v3107_v50 = vsub.f32 %v2845_v31, %v3097_v49  ;;  %v4211_v49 = vld [vmem:[%s5060_s6 + $0x8] sm:$0xff]  }
 0x87d   : > { %v3111_v51 = vmul.f32 1.442695, %v3107_v50 }
 0x87f   : > { %4261 = vpow2.f32 %v3111_v51  ;;  %v4212_v51 = vld [vmem:[%s5060_s6] sm:$0xff]  }
 0x886   : > { %v3103_v52 = vpop.xlane.xlu0 %3102 }
 0x887   : > { %v3109_v53 = vsub.f32 %v3009_v37, %v3103_v52 }
 0x889   : > { %v3115_v54 = vmul.f32 1.442695, %v3109_v53 }
 0x88b   : > { %4263 = vpow2.f32 %v3115_v54 }
 0x88c   : > { %v4262_v58 = vpop.eup %4261 }
 0x88d   : > { %v3119_v56 = vsel %vm960_vm5, %v4262_v58, 0.0 }
 0x88e   : > { %v3100_v60 = vpop.xlane.xlu1 %3099  ;;  %3120 = vadd.xlane.f32.xlu0 %v3119_v56 }
 0x88f   : > { %v3108_v46 = vsub.f32 %v2927_v41, %v3100_v60 }
 0x891   : > { %v3113_v61 = vmul.f32 1.442695, %v3108_v46 }
 0x892   : > { %v3222_v63 = vpop.permute.xlu1 %3221 }
 0x893   : > { %4265 = vpow2.f32 %v3113_v61  ;;  %4125 = vmatpush3.msk.msra.mxu0 %vm574_vm0, %v3222_v63 }
 0x894   : > { %4126 = vmatprep.subr.mxu0 %v4339_v1 }
 0x896   : > { %v3140_v62 = vpop.permute.xlu1 %3139  ;;  %v3106_v11 = vpop.xlane.xlu0 %3105 }
 0x897   : > { %v3110_v0 = vsub.f32 %v3091_v44, %v3106_v11 }
 0x898   : > { %v4264_v4 = vpop.eup %4263 }
 0x899   : > { %v3117_v6 = vmul.f32 1.442695, %v3110_v0  ;;  %v3125_v7 = vsel %vm960_vm5, %v4264_v4, 0.0 }
 0x89a   : > { %v3220_v9 = vpop.permute.xlu1 %3219  ;;  %3126 = vadd.xlane.f32.xlu0 %v3125_v7 }
 0x89b   : > { %4267 = vpow2.f32 %v3117_v6  ;;  %4127 = vmatpush3.msra.mxu0 %v3220_v9 }
 0x89c   : > { %4138 = vmatprep.subr.mxu0 %v4339_v1 }
 0x8a0   : > { %v4266_v15 = vpop.eup %4265 }
 0x8a1   : > { %v3122_v16 = vsel %vm960_vm5, %v4266_v15, 0.0 }
 0x8a2   : > { %3123 = vadd.xlane.f32.xlu1 %v3122_v16 }
 0x8a8   : > { %v4929_v17 = vpop.eup %4267 }
 0x8a9   : > { %v3128_v18 = vsel %vm960_vm5, %v4929_v17, 0.0 }
 0x8aa   : > { %3129 = vadd.xlane.f32.xlu1 %v3128_v18 }
 0x8b0   : > { %3141 = vrot.lane.b32.xlu0 %v4496_v47, %s4348_s13 }
 0x8b4   : > { %3301 = vrot.lane.b32.xlu0 %v4527_v2, %s4348_s13 }
 0x8b8   : > { %3299 = vrot.lane.b32.xlu0 %v4532_v5, %s4348_s13 }
 0x8bb   : > { %3379 = vrot.lane.b32.xlu1 %v4549_v12, %s4348_s13  ;;  %v3382_v12 = vpop.permute.xlu1 %3381  ;;  %s3790_s13 = sshll.u32 %s4420_s9, 9  ;;  %s5013_s9 = scalar_lea.sflag [#allocation4], %s315_s24 }
 0x8bc   : > { %2029 = vrot.lane.b32.xlu0 %v4791_v57, %s4349_s17  ;;  %s5007_s21 = scalar_lea.hbm %s5062_s8, %s3790_s13 }
 0x8bf   : > { %2031 = vrot.lane.b32.xlu1 %v4796_v3, %s4349_s17 }
 0x8c0   : > { %2033 = vrot.lane.b32.xlu0 %v4793_v59, %s4349_s17 }
 0x8c3   : > { %2035 = vrot.lane.b32.xlu1 %v4799_v10, %s4349_s17 }
 0x8c4   : > { %2746 = vrot.lane.b32.xlu0 %v4903_v27, %s4350_s18 }
 0x8c7   : > { %2748 = vrot.lane.b32.xlu1 %v4908_v34, %s4350_s18 }
 0x8c8   : > { %2750 = vrot.lane.b32.xlu0 %v4905_v29, %s4350_s18 }
 0x8cb   : > { %2752 = vrot.lane.b32.xlu1 %v4910_v36, %s4350_s18  ;;  %s3595_s18 = sshll.u32 %s317_s12, 4  ;;  %s5010_s18 = int_to_ptr.vmem [resolvable:$true] %s3595_s18 }
 0x8cc   : > { %s4277_s22 = scalar_lea.vmem %s5010_s18, 512  ;;  %p4284_p0 = scmp.lt.s32.totalorder %s5010_s18, %s4282_s25 }
 0x8cd   : > { %p4278_p11 = scmp.ne.s32.totalorder %s5010_s18, %s4277_s22  ;;  %p4285_p1 = scmp.lt.s32.totalorder %s4283_s26, %s4277_s22 }
 0x8cf   : > { %p4279_p12 = pnand %p4278_p11, %p4437_p5  ;;  %p4286_p2 = por %p4285_p1, %p4284_p0 }
 0x8d1   : > { %p4280_p13 = pneg %p4279_p12 }
 0x8d3   : > { %p4287_p3 = pnand %p4286_p2, %p4280_p13 }
 0x917   : > { %v3121_v47 = vpop.xlane.xlu0 %3120 }
 0x918   : > { %4269 = vrcp.f32 %v3121_v47 }
 0x923   : > { %v3127_v2 = vpop.xlane.xlu0 %3126 }
 0x924   : > { %4271 = vrcp.f32 %v3127_v2 }
 0x925   : > { %v4270_v5 = vpop.eup %4269 }
 0x926   : > { %v3135_v59 = vmul.f32 %v4270_v5, %v4262_v58 }
 0x927   : > { %v3142_v57 = vpop.permute.xlu0 %3141 }
 0x928   : > { %4118 = vmatpush3.msk.msra.mxu1 %vm574_vm0, %v3142_v57 }
 0x929   : > { %4119 = vmatprep.subr.mxu1 %v4339_v1 }
 0x92a   : > { %4120 = vmatpush3.msra.mxu1 %v3140_v62 }
 0x92b   : > { %v3124_v3 = vpop.xlane.xlu1 %3123  ;;  %4122 = vmatmul.mubr.msk.f32.vlgmr.msra.gmra.mxu1 %vm960_vm5, %v3135_v59  ;;  %4131 = vmatprep.subr.mxu1 %v4339_v1  ;;  %v3302_v10 = vpop.permute.xlu0 %3301 }
 0x92c   : > { %4273 = vrcp.f32 %v3124_v3  ;;  %4132 = vmatpush3.msk.msra.mxu1 %vm574_vm0, %v3302_v10  ;;  %4135 = vmatprep.mubr.msk.f32.mxu1 %vm4340_vm1, %v4339_v1 }
 0x92d   : > { %4133 = vmatprep.subr.mxu1 %v4339_v1 }
 0x92f   : > { %v3300_v19 = vpop.permute.xlu0 %3299 }
 0x930   : > { %4134 = vmatpush3.msra.mxu1 %v3300_v19 }
 0x931   : > { %v4272_v20 = vpop.eup %4271  ;;  %4145 = vmatprep.subr.bf16.mxu1 %v4211_v49 }
 0x932   : > { %v3137_v21 = vmul.f32 %v4272_v20, %v4264_v4 }
 0x933   : > { %v3130_v22 = vpop.xlane.xlu1 %3129  ;;  %v2030_v23 = vpop.permute.xlu0 %2029 }
 0x934   : > { %4275 = vrcp.f32 %v3130_v22  ;;  %v2041_v24 = vadd.f32 %v2030_v23, %v4508_v55  ;;  %4136 = vmatmul.mubr.msk.f32.vlgmr.msra.gmra.mxu1 %vm960_vm5, %v3137_v21 }
 0x935   : > { %4146 = vmatpush3.bf16.msra.mxu1 %v4211_v49 }
 0x936   : > { %2046 = vst.msk [vmem:[#allocation2] sm:$0xff] %vm2045_vm6, %v2041_v24  ;;  %4147 = vmatprep.subr.bf16.mxu1 %v4212_v51 }
 0x937   : > { %v3380_v25 = vpop.permute.xlu1 %3379  ;;  %v2034_v26 = vpop.permute.xlu0 %2033 }
 0x938   : > { %v2043_v27 = vadd.f32 %v2034_v26, %v4563_v13 }
 0x939   : > { %v4274_v28 = vpop.eup %4273  ;;  %4148 = vmatpush3.bf16.msra.mxu1 %v4212_v51 }
 0x93a   : > { %2048 = vst.msk [vmem:[#allocation2 + $0x10] sm:$0xff] %vm2045_vm6, %v2043_v27  ;;  %v3136_v29 = vmul.f32 %v4274_v28, %v4266_v15 }
 0x93b   : > { %v2032_v30 = vpop.permute.xlu1 %2031  ;;  %v2747_v31 = vpop.permute.xlu0 %2746 }
 0x93c   : > { %v2042_v32 = vadd.f32 %v2032_v30, %v4540_v8  ;;  %4129 = vmatmul.mubr.msk.f32.vlgmr.msra.gmra.mxu0 %vm960_vm5, %v3136_v29  ;;  %v2758_v33 = vadd.f32 %v2747_v31, %v4508_v55 }
 0x93d   : > { %4139 = vmatpush3.msk.msra.mxu0 %vm574_vm0, %v3382_v12  ;;  %4142 = vmatprep.mubr.msk.f32.mxu0 %vm4340_vm1, %v4339_v1 }
 0x93e   : > { %2047 = vst.msk [vmem:[#allocation2 + $0x8] sm:$0xff] %vm2045_vm6, %v2042_v32  ;;  %4140 = vmatprep.subr.mxu0 %v4339_v1 }
 0x93f   : > { %2763 = vst.msk [vmem:[#allocation2] sm:$0xff] %vm2762_vm7, %v2758_v33  ;;  %4141 = vmatpush3.msra.mxu0 %v3380_v25  ;;  %v2036_v34 = vpop.permute.xlu1 %2035  ;;  %v2751_v35 = vpop.permute.xlu0 %2750 }
 0x940   : > { %v2044_v36 = vadd.f32 %v2036_v34, %v4568_v14  ;;  %v2760_v37 = vadd.f32 %v2751_v35, %v4563_v13 }
 0x941   : > { %v4276_v38 = vpop.eup %4275 }
 0x942   : > { %2049 = vst.msk [vmem:[#allocation2 + $0x18] sm:$0xff] %vm2045_vm6, %v2044_v36  ;;  %v3138_v39 = vmul.f32 %v4276_v38, %v4929_v17 }
 0x943   : > { %2765 = vst.msk [vmem:[#allocation2 + $0x10] sm:$0xff] %vm2762_vm7, %v2760_v37  ;;  %v2749_v40 = vpop.permute.xlu1 %2748 }
 0x944   : > { %v2759_v41 = vadd.f32 %v2749_v40, %v4540_v8  ;;  %4143 = vmatmul.mubr.msk.f32.vlgmr.msra.gmra.mxu0 %vm960_vm5, %v3138_v39 }
 0x946   : > { %2764 = vst.msk [vmem:[#allocation2 + $0x8] sm:$0xff] %vm2762_vm7, %v2759_v41 }
 0x947   : > { %v2753_v1 = vpop.permute.xlu1 %2752 }
 0x948   : > { %v2761_v42 = vadd.f32 %v2753_v1, %v4568_v14 }
 0x94a   : > { %2766 = vst.msk [vmem:[#allocation2 + $0x18] sm:$0xff] %vm2762_vm7, %v2761_v42 }
 0x9eb   : > { %v3215_v43 = vpop.f32.mrf.mxu1 }
 0x9ec   : > { %3463 = vrot.lane.b32.xlu0 %v3215_v43, %s4351_s19 }
 0x9ed   : > { %v4123_v44 = vpop.f32.mrf.mxu1 }
 0x9f4   : > { %v3375_v45 = vpop.f32.mrf.mxu1 }
 0x9f5   : > { %3467 = vrot.lane.b32.xlu0 %v3375_v45, %s4351_s19 }
 0x9f6   : > { %v4137_v48 = vpop.f32.mrf.mxu1 }
 0x9fc   : > { %v3295_v50 = vpop.f32.mrf.mxu0 }
 0x9fd   : > { %3465 = vrot.lane.b32.xlu1 %v3295_v50, %s4351_s19 }
 0x9fe   : > { %v4130_v52 = vpop.f32.mrf.mxu0 }
 0xa04   : > { %v3455_v53 = vpop.f32.mrf.mxu0 }
 0xa05   : > { %3469 = vrot.lane.b32.xlu1 %v3455_v53, %s4351_s19 }
 0xa06   : > { %v4144_v54 = vpop.f32.mrf.mxu0 }
 0xa5e   : > { %v3464_v58 = vpop.permute.xlu0 %3463 }
 0xa5f   : > { %v3475_v56 = vadd.f32 %v3464_v58, %v4508_v55 }
 0xa61   : > { %3480 = vst.msk [vmem:[#allocation2] sm:$0xff] %vm3479_vm8, %v3475_v56 }
 0xa67   : > { %v3468_v60 = vpop.permute.xlu0 %3467 }
 0xa68   : > { %v3477_v46 = vadd.f32 %v3468_v60, %v4563_v13  ;;  %v3484_v0 = vld [vmem:[#allocation2] sm:$0xff] }
 0xa6a   : > { %3482 = vst.msk [vmem:[#allocation2 + $0x10] sm:$0xff] %vm3479_vm8, %v3477_v46 }
 0xa6f   : > { %v3466_v61 = vpop.permute.xlu1 %3465 }
 0xa70   : > { %v3476_v63 = vadd.f32 %v3466_v61, %v4540_v8  ;;  %v3779_v8 = vld [vmem:[%s5061_s7] ss:$0 sm:$0xff] }
 0xa71   : > { %v3486_v55 = vld [vmem:[#allocation2 + $0x10] sm:$0xff] }
 0xa72   : > { %3481 = vst.msk [vmem:[#allocation2 + $0x8] sm:$0xff] %vm3479_vm8, %v3476_v63 }
 0xa77   : > { %v3470_v62 = vpop.permute.xlu1 %3469 }
 0xa78   : > { %v3478_v11 = vadd.f32 %v3470_v62, %v4568_v14 }
 0xa79   : > { %v3485_v4 = vld [vmem:[#allocation2 + $0x8] sm:$0xff] }
 0xa7a   : > { %3483 = vst.msk [vmem:[#allocation2 + $0x18] sm:$0xff] %vm3479_vm8, %v3478_v11  ;;  %v3488_v6 = vpack.c.bf16 %v3485_v4, %v3484_v0 }
 0xa7c   : > { %4149 = vmatprep.mubr.msk.bf16.mxu1 %vm3513_vm9, %v3488_v6 }
 0xa81   : > { %v3487_v7 = vld [vmem:[#allocation2 + $0x18] sm:$0xff] }
 0xa82   : > { %v3489_v9 = vpack.c.bf16 %v3487_v7, %v3486_v55 }
 0xa84   : > { %4150 = vmatmul.mubr.msk.bf16.vlgmr.msra.gmra.mxu1 %vm3513_vm9, %v3489_v9 }
 0xb44   : > { %v4151_v13 = vpop.f32.mrf.mxu1 }
 0xb45   : > { %v3563_v14 = vadd.f32 %v4151_v13, %v3779_v8 }
 0xb46   : > { %v3554_v15 = vpop.f32.mrf.mxu1 }
 0xb47   : > { %v3571_v16 = vmax.f32 %v3563_v14, 0.0  ;;  %v3555_v17 = vadd.f32 %v3779_v8, %v3554_v15 }
 0xb48   : > { %v4152_v18 = vpop.f32.mrf.mxu1 }
 0xb49   : > { %v3575_v47 = vadd.f32 %v3571_v16, %v3486_v55  ;;  %v3569_v2 = vmax.f32 %v3555_v17, 0.0  ;;  %v3566_v5 = vadd.f32 %v4152_v18, %v3779_v8 }
 0xb4a   : > { %v3557_v12 = vpop.f32.mrf.mxu1 }
 0xb4b   : > { %3579 = vst.msk [vmem:[%s317_s12 + $0x10] sm:$0xff] %vm3513_vm9, %v3575_v47  ;;  %v3573_v57 = vadd.f32 %v3569_v2, %v3484_v0  ;;  %v3572_v59 = vmax.f32 %v3566_v5, 0.0  ;;  %v3558_v3 = vadd.f32 %v3779_v8, %v3557_v12 }
 0xb4d   : > { %3577 = vst.msk [vmem:[%s317_s12] sm:$0xff] %vm3513_vm9, %v3573_v57  ;;  %v3576_v10 = vadd.f32 %v3572_v59, %v3487_v7  ;;  %v3570_v19 = vmax.f32 %v3558_v3, 0.0 }
 0xb4f   : > { %3580 = vst.msk [vmem:[%s317_s12 + $0x18] sm:$0xff] %vm3513_vm9, %v3576_v10  ;;  %v3574_v20 = vadd.f32 %v3570_v19, %v3485_v4 }
 0xb51   : > { %3578 = vst.msk [vmem:[%s317_s12 + $0x8] sm:$0xff] %vm3513_vm9, %v3574_v20 }
 0xb52   : > { %4290 = shalt.err (!%p4287_p3)
}
 0xb53   : > { %s4291_s24 = scalar_lea.hbm %s5007_s21, 512  ;;  %s4295_s13 = scalar_lea.hbm %s5062_s8, 1024 }
 0xb54   : > { %p4292_p4 = scmp.ne.s32.totalorder %s5007_s21, %s4291_s24  ;;  %p4296_p9 = scmp.lt.s32.totalorder %s5007_s21, %s5062_s8 }
 0xb55   : > { %p4297_p10 = scmp.lt.s32.totalorder %s4295_s13, %s4291_s24 }
 0xb56   : > { %p4293_p7 = pnand %p4292_p4, %p4437_p5 }
 0xb57   : > { %p4298_p11 = por %p4297_p10, %p4296_p9 }
 0xb58   : > { %p4294_p8 = pneg %p4293_p7 }
 0xb5a   : > { %p4299_p12 = pnand %p4298_p11, %p4294_p8 }
 0xb5c   : > { %4302 = shalt.err (!%p4299_p12)
}
 0xb5d   : > { %s4353_s22 = smov 128  }
 0xb5e   : > { %4153 = dma.vmem_to_hbm [thread:$0]  (%p4437_p5), %s5010_s18, 512, %s5007_s21, %s5013_s9, %s4353_s22, %s4353_s22, %s4349_s17  }
 0xb5f PF: > { %p4159_p13 = scmp.ge.s32.totalorder %s4337_s30, 2  ;;  %s3610_s23 = sand.u32 1, %s4325_s27  }
 0xb60   : > { %s3611_s25 = scalar_lea.sflag [#allocation4], %s3610_s23 }
 0xb61   : > { %p4156_p0 = pnand %p4159_p13, %p4441_p6 }
 0xb63   : > { %p4157_p1 = pneg %p4156_p0 }
 0xb65   : > { %4320 = dma.done.wait (%p4157_p1), %s3611_s25, 512  }
 0xb66   : > { %4322 = vsyncadd (%p4157_p1), %s3611_s25, 4294966784  ;;  %p18_p2 = scmp.ge.s32.totalorder %s4424_s11, 4   ;;  %s5065_s27 = smov %s4329_s28 }
 0xb67   : > { %s5066_s28 = smov %s4333_s29  ;;  %s5067_s29 = smov %s4435_s14 }
 0xb68   : > { %s5068_s30 = smov %s4424_s11  ;;  %20 = sbr.rel (!%p18_p2) target bundleno = 3 (0x3), region = 90 }
 0xb6d   :  { %3616 = vsyncpa [#allocation4], 1 }
 0xb6e   :  { %3618 = vsyncpa [#allocation4 + $0x1], 1 }

</bundles_post_ra>
